<compile_context>
chip_gen: v7x
topology: tpu7x:2x2x1
jax: 0.10.0
libtpu: 0.0.40
codegen_flags: <defaults>
</compile_context>

<pallas_src>
import functools

import jax
import jax.numpy as jnp
from jax.experimental import pallas as pl
from jax.experimental.pallas import tpu as pltpu


def _round_up(x, m):
    return (x + m - 1) // m * m


# ---------------------------------------------------------------------------
# Kernel 1: fused 3x3 conv (both heads) + BN statistics accumulation.
# ---------------------------------------------------------------------------
def conv_stats_kernel(p_ref, w_ref, h_ref, sum_ref, ssq_ref):
    i = pl.program_id(0)
    # bf16 operands on the MXU, f32 accumulation.
    h = jnp.dot(p_ref[...], w_ref[...], preferred_element_type=jnp.float32)
    h_ref[...] = h

    @pl.when(i == 0)
    def _():
        sum_ref[...] = jnp.zeros_like(sum_ref)
        ssq_ref[...] = jnp.zeros_like(ssq_ref)

    sum_ref[...] += jnp.sum(h, axis=0, keepdims=True)
    ssq_ref[...] += jnp.sum(h * h, axis=0, keepdims=True)


# ---------------------------------------------------------------------------
# Kernel 2: BN (folded scale/shift) + ReLU + 1x1 conv (VPU lane reduce, K=1)
#           + ReLU + MSE(sum) loss accumulation.
# ---------------------------------------------------------------------------
def head_loss_kernel(h_ref, scale_ref, shift_ref, w1_ref, b_ref, *rest,
                     tile_p, p_valid, hw0, compute_loss):
    if compute_loss:
        ot_ref, pt_ref, obj_ref, parts_ref, loss_ref = rest
    else:
        obj_ref, parts_ref = rest

    i = pl.program_id(0)
    hb = jnp.maximum(h_ref[...] * scale_ref[...] + shift_ref[...], 0.0)

    w1 = w1_ref[...]                                       # (2, 128) masked rows
    y_obj = jnp.sum(hb * w1[0:1, :], axis=-1, keepdims=True) + b_ref[0]
    y_par = jnp.sum(hb * w1[1:2, :], axis=-1, keepdims=True) + b_ref[1]
    obj = jnp.maximum(y_obj, 0.0)
    par = jnp.maximum(y_par, 0.0)
    obj_ref[...] = obj
    parts_ref[...] = par

    if compute_loss:
        grow = i * tile_p + jax.lax.broadcasted_iota(jnp.int32, (tile_p, 1), 0)
        ovalid = (grow < p_valid).astype(jnp.float32)       # mask padded rows
        pvalid = (grow < hw0).astype(jnp.float32)           # sample 0 only
        do = (obj - ot_ref[...]) * ovalid
        dp = (par - pt_ref[...]) * pvalid
        oloss = jnp.sum(do * do)
        ploss = jnp.sum(dp * dp) * 0.33

        @pl.when(i == 0)
        def _():
            loss_ref[...] = jnp.zeros_like(loss_ref)

        lane = jax.lax.broadcasted_iota(jnp.int32, (1, 128), 1)
        loss_ref[...] += (jnp.where(lane == 0, oloss, 0.0) +
                          jnp.where(lane == 1, ploss, 0.0))


# ---------------------------------------------------------------------------
# Parameter init (kaiming-like synthetic init, matches the torch head layout).
# ---------------------------------------------------------------------------
def init_head_params(key, cin=64, channel=64, num_classes=1):
    k3, k1, kb = jax.random.split(key, 3)
    w3 = jax.random.normal(k3, (3, 3, cin, channel), jnp.float32) * (2.0 / (9 * cin)) ** 0.5
    w1 = jax.random.normal(k1, (channel, num_classes), jnp.float32) * (1.0 / channel) ** 0.5
    b1 = jax.random.uniform(kb, (1, num_classes), jnp.float32,
                            minval=-(1.0 / channel) ** 0.5, maxval=(1.0 / channel) ** 0.5)
    gamma = jnp.ones((1, channel), jnp.float32)
    beta = jnp.zeros((1, channel), jnp.float32)
    # flatten 3x3 weight into im2col layout: rows ordered (ky, kx, cin)
    return (w3.reshape(9 * cin, channel), gamma, beta, w1, b1)


# ---------------------------------------------------------------------------
# Forward wrapper.
# ---------------------------------------------------------------------------
def bc_mtl_forward(x_nchw, obj_params, parts_params, ground_truth=None,
                   train=True, tile_p=512):
    N, C, H, W = x_nchw.shape
    w3o, gamma_o, beta_o, w1o, b1o = obj_params
    w3p, gamma_p, beta_p, w1p, b1p = parts_params
    channel = w3o.shape[1]
    K = w1o.shape[1]
    assert K == 1, "optimized 1x1 path assumes num_classes == 1 (module default)"
    C2 = 2 * channel
    P = N * H * W
    HW0 = H * W

    Kc = 9 * C                                   # 576: kept unpadded (full-dim block)
    TP = min(tile_p, _round_up(P, 8))
    Pp = _round_up(P, TP)
    n_tiles = Pp // TP

    # im2col (glue, plain JAX, built directly in bf16 — the MXU operand dtype):
    # rows (n, h, w) row-major, cols (ky, kx, cin).
    x = jnp.transpose(x_nchw, (0, 2, 3, 1)).astype(jnp.bfloat16)
    xp = jnp.pad(x, ((0, 0), (1, 1), (1, 1), (0, 0)))
    cols = [xp[:, dy:dy + H, dx:dx + W, :] for dy in range(3) for dx in range(3)]
    patches = jnp.stack(cols, axis=3).reshape(P, Kc)
    patches = jnp.pad(patches, ((0, Pp - P), (0, 0)))            # pad rows only

    # Fused 3x3 weight for both heads: (Kc, 128), bf16 for the MXU.
    w3_cat = jnp.concatenate([w3o, w3p], axis=1).astype(jnp.bfloat16)

    flops = 2 * Pp * Kc * C2
    bytes_acc = Pp * Kc * 2 + Kc * C2 * 2 + Pp * C2 * 4 + 2 * C2 * 4
    h_f32, hsum, hssq = pl.pallas_call(
        conv_stats_kernel,
        out_shape=(jax.ShapeDtypeStruct((Pp, C2), jnp.float32),
                   jax.ShapeDtypeStruct((1, C2), jnp.float32),
                   jax.ShapeDtypeStruct((1, C2), jnp.float32)),
        grid=(n_tiles,),
        in_specs=[pl.BlockSpec((TP, Kc), lambda i: (i, 0)),
                  pl.BlockSpec((Kc, C2), lambda i: (0, 0))],
        out_specs=(pl.BlockSpec((TP, C2), lambda i: (i, 0)),
                   pl.BlockSpec((1, C2), lambda i: (0, 0)),
                   pl.BlockSpec((1, C2), lambda i: (0, 0))),
        compiler_params=pltpu.CompilerParams(dimension_semantics=("arbitrary",)),
        cost_estimate=pl.CostEstimate(flops=flops, transcendentals=0,
                                      bytes_accessed=bytes_acc),
    )(patches, w3_cat)

    # BatchNorm (training mode): batch mean / biased variance, eps = 1e-5,
    # folded into per-channel scale/shift. Padded rows contributed exact zeros,
    # so only the divisor (true pixel count P) matters.
    inv_p = 1.0 / float(P)
    mean = hsum * inv_p
    var = jnp.maximum(hssq * inv_p - mean * mean, 0.0)
    gamma = jnp.concatenate([gamma_o, gamma_p], axis=1)
    beta = jnp.concatenate([beta_o, beta_p], axis=1)
    bn_scale = gamma * jax.lax.rsqrt(var + 1e-5)
    bn_shift = beta - mean * bn_scale

    # 1x1 weights as two masked 128-lane rows (lane reduce instead of MXU).
    zc = jnp.zeros((channel,), jnp.float32)
    w1_rows = jnp.stack([jnp.concatenate([w1o[:, 0], zc]),
                         jnp.concatenate([zc, w1p[:, 0]])], axis=0)   # (2, 128)
    b_vec = jnp.concatenate([b1o.reshape(-1), b1p.reshape(-1)]).astype(jnp.float32)

    compute_loss = bool(train)
    kernel2 = functools.partial(head_loss_kernel, tile_p=TP, p_valid=P,
                                hw0=HW0, compute_loss=compute_loss)

    in_specs = [pl.BlockSpec((TP, C2), lambda i: (i, 0)),
                pl.BlockSpec((1, C2), lambda i: (0, 0)),
                pl.BlockSpec((1, C2), lambda i: (0, 0)),
                pl.BlockSpec((2, C2), lambda i: (0, 0)),
                pl.BlockSpec(memory_space=pltpu.MemorySpace.SMEM)]
    args = [h_f32, bn_scale, bn_shift, w1_rows, b_vec]
    out_shape = [jax.ShapeDtypeStruct((Pp, K), jnp.float32),
                 jax.ShapeDtypeStruct((Pp, K), jnp.float32)]
    out_specs = [pl.BlockSpec((TP, K), lambda i: (i, 0)),
                 pl.BlockSpec((TP, K), lambda i: (i, 0))]
    bytes_acc2 = Pp * C2 * 4 + 2 * Pp * K * 4 + 6 * C2 * 4

    if compute_loss:
        object_true, parts_true = ground_truth
        ot = object_true.reshape(P, K).astype(jnp.float32)
        ot = jnp.pad(ot, ((0, Pp - P), (0, 0)))
        pt = jnp.transpose(parts_true, (1, 2, 0)).reshape(HW0, K).astype(jnp.float32)
        pt = jnp.pad(pt, ((0, Pp - HW0), (0, 0)))
        in_specs += [pl.BlockSpec((TP, K), lambda i: (i, 0)),
                     pl.BlockSpec((TP, K), lambda i: (i, 0))]
        args += [ot, pt]
        out_shape.append(jax.ShapeDtypeStruct((1, 128), jnp.float32))
        out_specs.append(pl.BlockSpec((1, 128), lambda i: (0, 0)))
        bytes_acc2 += 2 * Pp * K * 4 + 128 * 4

    outs = pl.pallas_call(
        kernel2,
        out_shape=tuple(out_shape),
        grid=(n_tiles,),
        in_specs=in_specs,
        out_specs=tuple(out_specs),
        compiler_params=pltpu.CompilerParams(dimension_semantics=("arbitrary",)),
        cost_estimate=pl.CostEstimate(flops=6 * Pp * C2, transcendentals=0,
                                      bytes_accessed=bytes_acc2),
    )(*args)

    if compute_loss:
        obj_flat, parts_flat, loss_vec = outs
        object_loss = loss_vec[0, 0]
        parts_loss = loss_vec[0, 1]
        total_loss = object_loss + parts_loss
    else:
        obj_flat, parts_flat = outs

    obj_nhwc = obj_flat[:P].reshape(N, H, W, K)
    parts_pred = jnp.transpose(parts_flat[:P].reshape(N, H, W, K), (0, 3, 1, 2))  # NCHW

    if train:
        # torch branch returns object_pred already permuted to NHWC
        return obj_nhwc, parts_pred, object_loss, parts_loss, total_loss
    return jnp.transpose(obj_nhwc, (0, 3, 1, 2)), parts_pred


if __name__ == "__main__":
    key = jax.random.PRNGKey(0)
    kx, kg1, kg2, kpo, kpp = jax.random.split(key, 5)

    N, C, H, W, K = 2, 64, 16, 16, 1            # backbone output: 64 channels
    x = jax.random.normal(kx, (N, C, H, W), jnp.float32)
    object_true = jax.random.normal(kg1, (N, H, W, K), jnp.float32)
    parts_true = jax.random.normal(kg2, (K, H, W), jnp.float32)

    obj_params = init_head_params(kpo, cin=C, channel=64, num_classes=K)
    parts_params = init_head_params(kpp, cin=C, channel=64, num_classes=K)

    outs = bc_mtl_forward(x, obj_params, parts_params,
                          ground_truth=(object_true, parts_true), train=True)
    outs = jax.block_until_ready(outs)

    object_pred, parts_pred, object_loss, parts_loss, total_loss = outs
    assert object_pred.shape == (N, H, W, K)
    assert parts_pred.shape == (N, K, H, W)
    assert object_loss.shape == () and parts_loss.shape == () and total_loss.shape == ()
    print("KERNEL_OK")
</pallas_src>

<mosaic_0001>
module attributes {stable_mosaic.version = 11 : i64} {
  func.func @conv_stats_kernel(%arg0: i32, %arg1: memref<512x576xbf16, #tpu.memory_space<vmem>>, %arg2: memref<576x128xbf16, #tpu.memory_space<vmem>>, %arg3: memref<512x128xf32, #tpu.memory_space<vmem>>, %arg4: memref<1x128xf32, #tpu.memory_space<vmem>>, %arg5: memref<1x128xf32, #tpu.memory_space<vmem>>) attributes {dimension_semantics = [#tpu.dimension_semantics<arbitrary>], iteration_bounds = array<i64: 1>, scalar_prefetch = 0 : i64, scratch_operands = 0 : i64, tpu.core_type = #tpu.core_type<tc>, window_params = [{transform_indices = @transform_0, window_bounds = array<i64: 512, 576>}, {pipeline_mode = #tpu.pipeline_mode<synchronous>, transform_indices = @transform_1, window_bounds = array<i64: 576, 128>}, {transform_indices = @transform_2, window_bounds = array<i64: 512, 128>}, {pipeline_mode = #tpu.pipeline_mode<synchronous>, transform_indices = @transform_3, window_bounds = array<i64: 1, 128>}, {pipeline_mode = #tpu.pipeline_mode<synchronous>, transform_indices = @transform_4, window_bounds = array<i64: 1, 128>}]} {
    %c0 = arith.constant 0 : index
    %c0_0 = arith.constant 0 : index
    %0 = vector.load %arg1[%c0, %c0_0] : memref<512x576xbf16, #tpu.memory_space<vmem>>, vector<512x576xbf16>
    %c0_1 = arith.constant 0 : index
    %c0_2 = arith.constant 0 : index
    %1 = vector.load %arg2[%c0_1, %c0_2] : memref<576x128xbf16, #tpu.memory_space<vmem>>, vector<576x128xbf16>
    %cst = arith.constant dense<0.000000e+00> : vector<512x128xf32>
    %2 = tpu.matmul %0, %1, %cst {dimension_numbers = #tpu.dot_dimension_numbers<[1], [0], [0], [1], [0, 0, 1, 1], [], []>} : vector<512x576xbf16>, vector<576x128xbf16>, vector<512x128xf32> -> vector<512x128xf32>
    %c0_3 = arith.constant 0 : index
    %c0_4 = arith.constant 0 : index
    %3 = vector.load %arg3[%c0_3, %c0_4] : memref<512x128xf32, #tpu.memory_space<vmem>>, vector<512x128xf32>
    tpu.vector_store %arg3[%c0_3, %c0_4], %2 {strides = array<i32>} : memref<512x128xf32, #tpu.memory_space<vmem>>, vector<512x128xf32>,
    %c0_i32 = arith.constant 0 : i32
    %4 = arith.cmpi eq, %arg0, %c0_i32 : i32
    %5 = arith.extui %4 : i1 to i32
    %c0_i32_5 = arith.constant 0 : i32
    %6 = arith.cmpi ne, %5, %c0_i32_5 : i32
    scf.if %6 {
      %cst_16 = arith.constant 0.000000e+00 : f32
      %18 = vector.broadcast %cst_16 : f32 to vector<1x128xf32>
      %c0_17 = arith.constant 0 : index
      %c0_18 = arith.constant 0 : index
      %19 = vector.load %arg4[%c0_17, %c0_18] : memref<1x128xf32, #tpu.memory_space<vmem>>, vector<1x128xf32>
      tpu.vector_store %arg4[%c0_17, %c0_18], %18 {strides = array<i32>} : memref<1x128xf32, #tpu.memory_space<vmem>>, vector<1x128xf32>,
      %cst_19 = arith.constant 0.000000e+00 : f32
      %20 = vector.broadcast %cst_19 : f32 to vector<1x128xf32>
      %c0_20 = arith.constant 0 : index
      %c0_21 = arith.constant 0 : index
      %21 = vector.load %arg5[%c0_20, %c0_21] : memref<1x128xf32, #tpu.memory_space<vmem>>, vector<1x128xf32>
      tpu.vector_store %arg5[%c0_20, %c0_21], %20 {strides = array<i32>} : memref<1x128xf32, #tpu.memory_space<vmem>>, vector<1x128xf32>,
    } else {
    }
    %c0_6 = arith.constant 0 : index
    %c0_7 = arith.constant 0 : index
    %7 = vector.load %arg4[%c0_6, %c0_7] : memref<1x128xf32, #tpu.memory_space<vmem>>, vector<1x128xf32>
    %cst_8 = arith.constant dense<0.000000e+00> : vector<128xf32>
    %8 = vector.multi_reduction <add>, %2, %cst_8 [0] : vector<512x128xf32> to vector<128xf32>
    %9 = vector.shape_cast %8 : vector<128xf32> to vector<1x128xf32>
    %10 = arith.addf %7, %9 : vector<1x128xf32>
    %c0_9 = arith.constant 0 : index
    %c0_10 = arith.constant 0 : index
    %11 = vector.load %arg4[%c0_9, %c0_10] : memref<1x128xf32, #tpu.memory_space<vmem>>, vector<1x128xf32>
    tpu.vector_store %arg4[%c0_9, %c0_10], %10 {strides = array<i32>} : memref<1x128xf32, #tpu.memory_space<vmem>>, vector<1x128xf32>,
    %c0_11 = arith.constant 0 : index
    %c0_12 = arith.constant 0 : index
    %12 = vector.load %arg5[%c0_11, %c0_12] : memref<1x128xf32, #tpu.memory_space<vmem>>, vector<1x128xf32>
    %13 = arith.mulf %2, %2 : vector<512x128xf32>
    %cst_13 = arith.constant dense<0.000000e+00> : vector<128xf32>
    %14 = vector.multi_reduction <add>, %13, %cst_13 [0] : vector<512x128xf32> to vector<128xf32>
    %15 = vector.shape_cast %14 : vector<128xf32> to vector<1x128xf32>
    %16 = arith.addf %12, %15 : vector<1x128xf32>
    %c0_14 = arith.constant 0 : index
    %c0_15 = arith.constant 0 : index
    %17 = vector.load %arg5[%c0_14, %c0_15] : memref<1x128xf32, #tpu.memory_space<vmem>>, vector<1x128xf32>
    tpu.vector_store %arg5[%c0_14, %c0_15], %16 {strides = array<i32>} : memref<1x128xf32, #tpu.memory_space<vmem>>, vector<1x128xf32>,
    return
  }
  func.func @transform_0(%arg0: i32) -> (i32, i32) {
    %c0_i32 = arith.constant 0 : i32
    %c0_i32_0 = arith.constant 0 : i32
    return %arg0, %c0_i32 : i32, i32
  }
  func.func @transform_1(%arg0: i32) -> (i32, i32) {
    %c0_i32 = arith.constant 0 : i32
    %c0_i32_0 = arith.constant 0 : i32
    %c0_i32_1 = arith.constant 0 : i32
    return %c0_i32, %c0_i32_0 : i32, i32
  }
  func.func @transform_2(%arg0: i32) -> (i32, i32) {
    %c0_i32 = arith.constant 0 : i32
    %c0_i32_0 = arith.constant 0 : i32
    return %arg0, %c0_i32 : i32, i32
  }
  func.func @transform_3(%arg0: i32) -> (i32, i32) {
    %c0_i32 = arith.constant 0 : i32
    %c0_i32_0 = arith.constant 0 : i32
    %c0_i32_1 = arith.constant 0 : i32
    return %c0_i32, %c0_i32_0 : i32, i32
  }
  func.func @transform_4(%arg0: i32) -> (i32, i32) {
    %c0_i32 = arith.constant 0 : i32
    %c0_i32_0 = arith.constant 0 : i32
    %c0_i32_1 = arith.constant 0 : i32
    return %c0_i32, %c0_i32_0 : i32, i32
  }
}

</mosaic_0001>

<bundles_post_ra>
// kernel: tpu_custom_call.1
= control target key start
LH: loop header
LB: loop body
LE: loop exit
PB: predicated region body
PF: predicated region fallthrough
CT: control target
= control target key end

     0   :  { %10 = vsyncpa [#allocation3], 0  ;;  %v3367_v1 = vmov 0   ;;  %s4423_s0 = inlined_call_operand.vmem [shape: bf16[512,576], index: 0, kind: input, shape index: {}]   ;;  %s4424_s1 = inlined_call_operand.vmem [shape: bf16[576,128], index: 1, kind: input, shape index: {}]   ;;  %s4425_s2 = inlined_call_operand.hbm [shape: f32[512,128], index: 2, kind: output, shape index: {0}]   ;;  %s4426_s3 = inlined_call_operand.hbm [shape: f32[1,128], index: 3, kind: output, shape index: {1}]   ;;  %s4427_s4 = inlined_call_operand.hbm [shape: f32[1,128], index: 4, kind: output, shape index: {2}]  }
   0x1   :  { %v3037_v0 = vld [vmem:[%s4424_s1] sm:$0xff]   ;;  %1394 = vmatprep.subr.bf16.mxu0 %v3367_v1  ;;  %2918 = vmatprep.subr.bf16.mxu1 %v3367_v1  ;;  %v3038_v2 = vld [vmem:[%s4424_s1 + $0x8] sm:$0xff]   ;;  %v3039_v3 = vld [vmem:[%s4424_s1 + $0x10] sm:$0xff]  }
   0x2   :  { %1395 = vmatpush1.bf16.msra.mxu0 %v3037_v0  ;;  %2934 = vmatpush1.bf16.msra.mxu1 %v3037_v0  ;;  %v3040_v4 = vld [vmem:[%s4424_s1 + $0x18] sm:$0xff]   ;;  %v3041_v5 = vld [vmem:[%s4424_s1 + $0x20] sm:$0xff]   ;;  %v3042_v7 = vld [vmem:[%s4424_s1 + $0x28] sm:$0xff]  }
   0x3   :  { %1396 = vmatprep.subr.bf16.mxu0 %v3367_v1  ;;  %2919 = vmatprep.subr.bf16.mxu1 %v3367_v1  ;;  %v3055_v6 = vld [vmem:[%s4423_s0 + $0x4] ss:$20 sps:$4 sm:$0xff]   ;;  %v3043_v9 = vld [vmem:[%s4424_s1 + $0x30] sm:$0xff]   ;;  %v3046_v12 = vld [vmem:[%s4424_s1 + $0x48] sm:$0xff]  }
   0x4   :  { %v3058_v8 = vld [vmem:[%s4423_s0 + $0x144] ss:$20 sps:$4 sm:$0xff]   ;;  %1426 = vmatprep.mubr.bf16.mxu0 %v3055_v6  ;;  %v3047_v13 = vld [vmem:[%s4424_s1 + $0x50] sm:$0xff]   ;;  %v3050_v16 = vld [vmem:[%s4424_s1 + $0x68] sm:$0xff]  }
   0x5   :  { %1490 = vmatprep.mubr.bf16.mxu1 %v3058_v8  ;;  %v3044_v10 = vld [vmem:[%s4424_s1 + $0x38] sm:$0xff]   ;;  %v3045_v11 = vld [vmem:[%s4424_s1 + $0x40] sm:$0xff]   ;;  %v3051_v17 = vld [vmem:[%s4424_s1 + $0x70] sm:$0xff]  }
   0x6   :  { %1397 = vmatpush1.bf16.msra.mxu0 %v3038_v2  ;;  %2935 = vmatpush1.bf16.msra.mxu1 %v3038_v2  ;;  %v3048_v14 = vld [vmem:[%s4424_s1 + $0x58] sm:$0xff]   ;;  %v3049_v15 = vld [vmem:[%s4424_s1 + $0x60] sm:$0xff]   ;;  %v3108_v25 = vld [vmem:[%s4424_s1 + $0x108] sm:$0xff]  }
   0x7   :  { %1398 = vmatprep.subr.bf16.mxu0 %v3367_v1  ;;  %2920 = vmatprep.subr.bf16.mxu1 %v3367_v1  ;;  %v3052_v18 = vld [vmem:[%s4424_s1 + $0x78] sm:$0xff]   ;;  %v3059_v19 = vld [vmem:[%s4424_s1 + $0x100] sm:$0xff]   ;;  %v3061_v26 = vld [vmem:[%s4424_s1 + $0x88] sm:$0xff]  }
   0x8   :  { %v3053_v20 = vld [vmem:[%s4423_s0] ss:$20 sps:$4 sm:$0xff]   ;;  %v3066_v27 = vld [vmem:[%s4423_s0 + $0x28] ss:$20 sps:$4 sm:$0xff]   ;;  %v3074_v34 = vld [vmem:[%s4423_s0 + $0x50] ss:$20 sps:$4 sm:$0xff]  }
   0x9   :  { %v3056_v21 = vld [vmem:[%s4423_s0 + $0x140] ss:$20 sps:$4 sm:$0xff]   ;;  %v3067_v28 = vld [vmem:[%s4423_s0 + $0x168] ss:$20 sps:$4 sm:$0xff]   ;;  %v3075_v35 = vld [vmem:[%s4423_s0 + $0x190] ss:$20 sps:$4 sm:$0xff]  }
   0xa   :  { %1399 = vmatpush1.bf16.msra.mxu0 %v3039_v3  ;;  %2936 = vmatpush1.bf16.msra.mxu1 %v3039_v3  ;;  %v3060_v22 = vld [vmem:[%s4424_s1 + $0x80] sm:$0xff]   ;;  %v3068_v29 = vld [vmem:[%s4424_s1 + $0x90] sm:$0xff]   ;;  %v3069_v33 = vld [vmem:[%s4424_s1 + $0x98] sm:$0xff]  }
   0xb   :  { %1400 = vmatprep.subr.bf16.mxu0 %v3367_v1  ;;  %2921 = vmatprep.subr.bf16.mxu1 %v3367_v1  ;;  %v3062_v23 = vld [vmem:[%s4423_s0 + $0x2c] ss:$20 sps:$4 sm:$0xff]   ;;  %v3149_v30 = vld [vmem:[%s4424_s1 + $0x110] sm:$0xff]   ;;  %v3086_v43 = vld [vmem:[%s4423_s0 + $0xa4] ss:$20 sps:$4 sm:$0xff]  }
   0xc   :  { %v3064_v24 = vld [vmem:[%s4423_s0 + $0x16c] ss:$20 sps:$4 sm:$0xff]   ;;  %v3070_v31 = vld [vmem:[%s4423_s0 + $0x54] ss:$20 sps:$4 sm:$0xff]   ;;  %v3078_v37 = vld [vmem:[%s4423_s0 + $0x7c] ss:$20 sps:$4 sm:$0xff]  }
   0xd   :  { %v3072_v32 = vld [vmem:[%s4423_s0 + $0x194] ss:$20 sps:$4 sm:$0xff]   ;;  %v3076_v36 = vld [vmem:[%s4424_s1 + $0xa0] sm:$0xff]   ;;  %v3080_v38 = vld [vmem:[%s4423_s0 + $0x1bc] ss:$20 sps:$4 sm:$0xff]  }
   0xe   :  { %1401 = vmatpush1.bf16.msra.mxu0 %v3040_v4  ;;  %2937 = vmatpush1.bf16.msra.mxu1 %v3040_v4  ;;  %v3077_v39 = vld [vmem:[%s4424_s1 + $0xa8] sm:$0xff]   ;;  %v3084_v42 = vld [vmem:[%s4424_s1 + $0xb0] sm:$0xff]   ;;  %v3186_v44 = vld [vmem:[%s4424_s1 + $0x118] sm:$0xff]  }
   0xf   :  { %1402 = vmatprep.subr.bf16.mxu0 %v3367_v1  ;;  %2922 = vmatprep.subr.bf16.mxu1 %v3367_v1  ;;  %v3082_v40 = vld [vmem:[%s4423_s0 + $0x78] ss:$20 sps:$4 sm:$0xff]   ;;  %v3090_v47 = vld [vmem:[%s4423_s0 + $0xa0] ss:$20 sps:$4 sm:$0xff]   ;;  %v3098_v53 = vld [vmem:[%s4423_s0 + $0xc8] ss:$20 sps:$4 sm:$0xff]  }
  0x10   :  { %v3083_v41 = vld [vmem:[%s4423_s0 + $0x1b8] ss:$20 sps:$4 sm:$0xff]   ;;  %v3091_v48 = vld [vmem:[%s4423_s0 + $0x1e0] ss:$20 sps:$4 sm:$0xff]   ;;  %v3099_v54 = vld [vmem:[%s4423_s0 + $0x208] ss:$20 sps:$4 sm:$0xff]  }
  0x11   :  { %v3088_v45 = vld [vmem:[%s4423_s0 + $0x1e4] ss:$20 sps:$4 sm:$0xff]   ;;  %v3094_v50 = vld [vmem:[%s4423_s0 + $0xcc] ss:$20 sps:$4 sm:$0xff]   ;;  %v3100_v55 = vld [vmem:[%s4424_s1 + $0xd0] sm:$0xff]  }
  0x12   :  { %1403 = vmatpush1.bf16.msra.mxu0 %v3041_v5  ;;  %2938 = vmatpush1.bf16.msra.mxu1 %v3041_v5  ;;  %v3085_v46 = vld [vmem:[%s4424_s1 + $0xb8] sm:$0xff]   ;;  %v3092_v49 = vld [vmem:[%s4424_s1 + $0xc0] sm:$0xff]   ;;  %v3093_v52 = vld [vmem:[%s4424_s1 + $0xc8] sm:$0xff]  }
  0x13   :  { %1404 = vmatprep.subr.bf16.mxu0 %v3367_v1  ;;  %2923 = vmatprep.subr.bf16.mxu1 %v3367_v1  ;;  %v3096_v51 = vld [vmem:[%s4423_s0 + $0x20c] ss:$20 sps:$4 sm:$0xff]   ;;  %v3102_v56 = vld [vmem:[%s4423_s0 + $0xf4] ss:$20 sps:$4 sm:$0xff]   ;;  %v3101_v58 = vld [vmem:[%s4424_s1 + $0xd8] sm:$0xff]  }
  0x14   :  { %v3104_v57 = vld [vmem:[%s4423_s0 + $0x234] ss:$20 sps:$4 sm:$0xff]   ;;  %v3106_v59 = vld [vmem:[%s4423_s0 + $0xf0] ss:$20 sps:$4 sm:$0xff]   ;;  %v3115_v2 = vld [vmem:[%s4423_s0 + $0x118] ss:$20 sps:$4 sm:$0xff]  }
  0x15   :  { %v3107_v60 = vld [vmem:[%s4423_s0 + $0x230] ss:$20 sps:$4 sm:$0xff]   ;;  %v3110_v0 = vld [vmem:[%s4424_s1 + $0xe8] sm:$0xff]  }
  0x16   :  { %1405 = vmatpush1.bf16.msra.mxu0 %v3042_v7  ;;  %2939 = vmatpush1.bf16.msra.mxu1 %v3042_v7  ;;  %v3109_v61 = vld [vmem:[%s4424_s1 + $0xe0] sm:$0xff]   ;;  %v3111_v62 = vld [vmem:[%s4423_s0 + $0x11c] ss:$20 sps:$4 sm:$0xff]   ;;  %v3116_v3 = vld [vmem:[%s4423_s0 + $0x258] ss:$20 sps:$4 sm:$0xff]  }
  0x17   :  { %1406 = vmatprep.subr.bf16.mxu0 %v3367_v1  ;;  %2924 = vmatprep.subr.bf16.mxu1 %v3367_v1  ;;  %v3113_v63 = vld [vmem:[%s4423_s0 + $0x25c] ss:$20 sps:$4 sm:$0xff]   ;;  %v3119_v5 = vld [vmem:[%s4423_s0 + $0x284] ss:$20 sps:$4 sm:$0xff]   ;;  %v3123_v6 = vld [vmem:[%s4423_s0 + $0xc] ss:$20 sps:$4 sm:$0xff]  }
  0x18   :  { %v3117_v4 = vld [vmem:[%s4424_s1 + $0xf0] sm:$0xff]   ;;  %v3118_v7 = vld [vmem:[%s4424_s1 + $0xf8] sm:$0xff]  }
  0x19   :  { %v3121_v8 = vld [vmem:[%s4423_s0 + $0x8] ss:$20 sps:$4 sm:$0xff]  }
  0x1a   :  { %1407 = vmatpush1.bf16.msra.mxu0 %v3043_v9  ;;  %2940 = vmatpush1.bf16.msra.mxu1 %v3043_v9  ;;  %v3124_v9 = vld [vmem:[%s4423_s0 + $0x280] ss:$20 sps:$4 sm:$0xff]  }
  0x1b   :  { %1408 = vmatprep.subr.bf16.mxu0 %v3367_v1  ;;  %2925 = vmatprep.subr.bf16.mxu1 %v3367_v1 }
  0x1e   :  { %1409 = vmatpush1.bf16.msra.mxu0 %v3044_v10  ;;  %2941 = vmatpush1.bf16.msra.mxu1 %v3044_v10  ;;  %v3125_v10 = vld [vmem:[%s4423_s0 + $0x2ac] ss:$20 sps:$4 sm:$0xff]  }
  0x1f   :  { %1410 = vmatprep.subr.bf16.mxu0 %v3367_v1  ;;  %2926 = vmatprep.subr.bf16.mxu1 %v3367_v1 }
  0x22   :  { %1411 = vmatpush1.bf16.msra.mxu0 %v3045_v11  ;;  %2942 = vmatpush1.bf16.msra.mxu1 %v3045_v11  ;;  %v3127_v11 = vld [vmem:[%s4423_s0 + $0x34] ss:$20 sps:$4 sm:$0xff]  }
  0x23   :  { %1412 = vmatprep.subr.bf16.mxu0 %v3367_v1  ;;  %2927 = vmatprep.subr.bf16.mxu1 %v3367_v1 }
  0x26   :  { %1413 = vmatpush1.bf16.msra.mxu0 %v3046_v12  ;;  %2943 = vmatpush1.bf16.msra.mxu1 %v3046_v12  ;;  %v3130_v12 = vld [vmem:[%s4423_s0 + $0x30] ss:$20 sps:$4 sm:$0xff]  }
  0x27   :  { %1414 = vmatprep.subr.bf16.mxu0 %v3367_v1  ;;  %2928 = vmatprep.subr.bf16.mxu1 %v3367_v1 }
  0x2a   :  { %1415 = vmatpush1.bf16.msra.mxu0 %v3047_v13  ;;  %2944 = vmatpush1.bf16.msra.mxu1 %v3047_v13  ;;  %v3131_v13 = vld [vmem:[%s4423_s0 + $0x2d4] ss:$20 sps:$4 sm:$0xff]  }
  0x2b   :  { %1416 = vmatprep.subr.bf16.mxu0 %v3367_v1  ;;  %2929 = vmatprep.subr.bf16.mxu1 %v3367_v1 }
  0x2e   :  { %1417 = vmatpush1.bf16.msra.mxu0 %v3048_v14  ;;  %2945 = vmatpush1.bf16.msra.mxu1 %v3048_v14  ;;  %v3133_v14 = vld [vmem:[%s4423_s0 + $0x5c] ss:$20 sps:$4 sm:$0xff]  }
  0x2f   :  { %1418 = vmatprep.subr.bf16.mxu0 %v3367_v1  ;;  %2930 = vmatprep.subr.bf16.mxu1 %v3367_v1 }
  0x32   :  { %1419 = vmatpush1.bf16.msra.mxu0 %v3049_v15  ;;  %2946 = vmatpush1.bf16.msra.mxu1 %v3049_v15 }
  0x33   :  { %1420 = vmatprep.subr.bf16.mxu0 %v3367_v1  ;;  %2931 = vmatprep.subr.bf16.mxu1 %v3367_v1 }
  0x36   :  { %1421 = vmatpush1.bf16.msra.mxu0 %v3050_v16  ;;  %2947 = vmatpush1.bf16.msra.mxu1 %v3050_v16 }
  0x37   :  { %1422 = vmatprep.subr.bf16.mxu0 %v3367_v1  ;;  %2932 = vmatprep.subr.bf16.mxu1 %v3367_v1 }
  0x3a   :  { %1423 = vmatpush1.bf16.msra.mxu0 %v3051_v17  ;;  %2948 = vmatpush1.bf16.msra.mxu1 %v3051_v17 }
  0x3b   :  { %1424 = vmatprep.subr.bf16.mxu0 %v3367_v1  ;;  %2933 = vmatprep.subr.bf16.mxu1 %v3367_v1 }
  0x3e   :  { %1425 = vmatpush1.bf16.msra.mxu0 %v3052_v18  ;;  %2949 = vmatpush1.bf16.msra.mxu1 %v3052_v18 }
  0x3f   :  { %1683 = vmatprep.subr.bf16.mxu0 %v3367_v1  ;;  %2846 = vmatprep.subr.bf16.mxu1 %v3059_v19 }
  0x41   :  { %1427 = vmatmul.mubr.bf16.vlgmr.msra.gmra.mrb[0].mxu0 %v3053_v20  ;;  %1491 = vmatmul.mubr.bf16.vlgmr.msra.gmra.mrb[0].mxu1 %v3056_v21 }
  0x42   :  { %1684 = vmatpush1.bf16.msra.mxu0 %v3060_v22  ;;  %2847 = vmatpush3.bf16.msra.mxu1 %v3059_v19 }
  0x43   :  { %1685 = vmatprep.subr.bf16.mxu0 %v3367_v1  ;;  %1434 = vmatprep.mubr.bf16.mxu0 %v3062_v23 }
  0x44   :  { %1498 = vmatprep.mubr.bf16.mxu1 %v3064_v24  ;;  %2848 = vmatprep.subr.bf16.mxu1 %v3108_v25 }
  0x46   :  { %1686 = vmatpush1.bf16.msra.mxu0 %v3061_v26  ;;  %2849 = vmatpush3.bf16.msra.mxu1 %v3108_v25 }
  0x47   :  { %1687 = vmatprep.subr.bf16.mxu0 %v3367_v1  ;;  %2850 = vmatprep.subr.bf16.mxu1 %v3149_v30 }
  0x49   :  { %1435 = vmatmul.mubr.bf16.gmra.mrb[4].mxu0 %v3066_v27  ;;  %1499 = vmatmul.mubr.bf16.gmra.mrb[4].mxu1 %v3067_v28 }
  0x4a   :  { %1688 = vmatpush1.bf16.msra.mxu0 %v3068_v29  ;;  %1442 = vmatprep.mubr.bf16.mxu0 %v3070_v31 }
  0x4b   :  { %1689 = vmatprep.subr.bf16.mxu0 %v3367_v1  ;;  %1506 = vmatprep.mubr.bf16.mxu1 %v3072_v32 }
  0x4c   :  { %2851 = vmatpush3.bf16.msra.mxu1 %v3149_v30 }
  0x4d   :  { %2852 = vmatprep.subr.bf16.mxu1 %v3186_v44 }
  0x4e   :  { %1690 = vmatpush1.bf16.msra.mxu0 %v3069_v33 }
  0x4f   :  { %1691 = vmatprep.subr.bf16.mxu0 %v3367_v1 }
  0x50   :  { %2853 = vmatpush3.bf16.msra.mxu1 %v3186_v44 }
  0x51   :  { %1443 = vmatmul.mubr.bf16.gmra.mrb[8].mxu0 %v3074_v34  ;;  %1507 = vmatmul.mubr.bf16.gmra.mrb[8].mxu1 %v3075_v35 }
  0x52   :  { %1692 = vmatpush1.bf16.msra.mxu0 %v3076_v36  ;;  %1450 = vmatprep.mubr.bf16.mxu0 %v3078_v37 }
  0x53   :  { %1693 = vmatprep.subr.bf16.mxu0 %v3367_v1  ;;  %1514 = vmatprep.mubr.bf16.mxu1 %v3080_v38 }
  0x56   :  { %1694 = vmatpush1.bf16.msra.mxu0 %v3077_v39 }
  0x57   :  { %1695 = vmatprep.subr.bf16.mxu0 %v3367_v1 }
  0x59   :  { %1451 = vmatmul.mubr.bf16.gmra.mrb[12].mxu0 %v3082_v40  ;;  %1515 = vmatmul.mubr.bf16.gmra.mrb[12].mxu1 %v3083_v41 }
  0x5a   :  { %1696 = vmatpush1.bf16.msra.mxu0 %v3084_v42  ;;  %1458 = vmatprep.mubr.bf16.mxu0 %v3086_v43 }
  0x5b   :  { %1697 = vmatprep.subr.bf16.mxu0 %v3367_v1  ;;  %1522 = vmatprep.mubr.bf16.mxu1 %v3088_v45 }
  0x5e   :  { %1698 = vmatpush1.bf16.msra.mxu0 %v3085_v46 }
  0x5f   :  { %1699 = vmatprep.subr.bf16.mxu0 %v3367_v1 }
  0x61   :  { %1459 = vmatmul.mubr.bf16.gmra.mrb[16].mxu0 %v3090_v47  ;;  %1523 = vmatmul.mubr.bf16.gmra.mrb[16].mxu1 %v3091_v48 }
  0x62   :  { %1700 = vmatpush1.bf16.msra.mxu0 %v3092_v49  ;;  %1466 = vmatprep.mubr.bf16.mxu0 %v3094_v50 }
  0x63   :  { %1701 = vmatprep.subr.bf16.mxu0 %v3367_v1  ;;  %1530 = vmatprep.mubr.bf16.mxu1 %v3096_v51 }
  0x66   :  { %1702 = vmatpush1.bf16.msra.mxu0 %v3093_v52 }
  0x67   :  { %1703 = vmatprep.subr.bf16.mxu0 %v3367_v1 }
  0x69   :  { %1467 = vmatmul.mubr.bf16.gmra.mrb[20].mxu0 %v3098_v53  ;;  %1531 = vmatmul.mubr.bf16.gmra.mrb[20].mxu1 %v3099_v54 }
  0x6a   :  { %1704 = vmatpush1.bf16.msra.mxu0 %v3100_v55  ;;  %1474 = vmatprep.mubr.bf16.mxu0 %v3102_v56 }
  0x6b   :  { %1705 = vmatprep.subr.bf16.mxu0 %v3367_v1  ;;  %1538 = vmatprep.mubr.bf16.mxu1 %v3104_v57 }
  0x6e   :  { %1706 = vmatpush1.bf16.msra.mxu0 %v3101_v58 }
  0x6f   :  { %1707 = vmatprep.subr.bf16.mxu0 %v3367_v1 }
  0x71   :  { %1475 = vmatmul.mubr.bf16.gmra.mrb[24].mxu0 %v3106_v59  ;;  %1539 = vmatmul.mubr.bf16.gmra.mrb[24].mxu1 %v3107_v60 }
  0x72   :  { %1708 = vmatpush1.bf16.msra.mxu0 %v3109_v61  ;;  %1482 = vmatprep.mubr.bf16.mxu0 %v3111_v62 }
  0x73   :  { %1709 = vmatprep.subr.bf16.mxu0 %v3367_v1  ;;  %1546 = vmatprep.mubr.bf16.mxu1 %v3113_v63 }
  0x76   :  { %1710 = vmatpush1.bf16.msra.mxu0 %v3110_v0 }
  0x77   :  { %1711 = vmatprep.subr.bf16.mxu0 %v3367_v1 }
  0x79   :  { %1483 = vmatmul.mubr.bf16.gmra.mrb[28].mxu0 %v3115_v2  ;;  %1547 = vmatmul.mubr.bf16.gmra.mrb[28].mxu1 %v3116_v3 }
  0x7a   :  { %1712 = vmatpush1.bf16.msra.mxu0 %v3117_v4  ;;  %1554 = vmatprep.mubr.bf16.mxu1 %v3119_v5 }
  0x7b   :  { %1713 = vmatprep.subr.bf16.mxu0 %v3367_v1  ;;  %1715 = vmatprep.mubr.bf16.mxu0 %v3123_v6  ;;  %v3129_v1 = vld [vmem:[%s4423_s0 + $0x2a8] ss:$20 sps:$4 sm:$0xff]  }
  0x7e   :  { %1714 = vmatpush1.bf16.msra.mxu0 %v3118_v7 }
  0x81   :  { %1555 = vmatmul.mubr.bf16.gmra.mrb[32].mxu1 %v3124_v9  ;;  %1716 = vmatmul.mubr.bf16.vlgmr.msra.gmra.mrb[0].mxu0 %v3121_v8 }
  0x82   :  { %1562 = vmatprep.mubr.bf16.mxu1 %v3125_v10  ;;  %1723 = vmatprep.mubr.bf16.mxu0 %v3127_v11 }
  0x83   :  { %11 = vsyncpa [#allocation5], 0  ;;  %v3135_v15 = vld [vmem:[%s4423_s0 + $0x2d0] ss:$20 sps:$4 sm:$0xff]   ;;  %v3136_v16 = vld [vmem:[%s4423_s0 + $0x58] ss:$20 sps:$4 sm:$0xff]  }
  0x84   :  { %v3137_v17 = vld [vmem:[%s4423_s0 + $0x2fc] ss:$20 sps:$4 sm:$0xff]   ;;  %v3139_v18 = vld [vmem:[%s4423_s0 + $0x84] ss:$20 sps:$4 sm:$0xff]   ;;  %v3142_v20 = vld [vmem:[%s4423_s0 + $0x80] ss:$20 sps:$4 sm:$0xff]  }
  0x85   :  { %v3141_v19 = vld [vmem:[%s4423_s0 + $0x2f8] ss:$20 sps:$4 sm:$0xff]   ;;  %v3147_v23 = vld [vmem:[%s4423_s0 + $0x320] ss:$20 sps:$4 sm:$0xff]   ;;  %v3148_v24 = vld [vmem:[%s4423_s0 + $0xa8] ss:$20 sps:$4 sm:$0xff]  }
  0x86   :  { %v3143_v21 = vld [vmem:[%s4423_s0 + $0x324] ss:$20 sps:$4 sm:$0xff]   ;;  %v3145_v22 = vld [vmem:[%s4423_s0 + $0xac] ss:$20 sps:$4 sm:$0xff]   ;;  %v3152_v26 = vld [vmem:[%s4423_s0 + $0xd4] ss:$20 sps:$4 sm:$0xff]  }
  0x87   :  { %v3150_v25 = vld [vmem:[%s4423_s0 + $0x34c] ss:$20 sps:$4 sm:$0xff]   ;;  %v3154_v27 = vld [vmem:[%s4423_s0 + $0x348] ss:$20 sps:$4 sm:$0xff]   ;;  %v3155_v28 = vld [vmem:[%s4423_s0 + $0xd0] ss:$20 sps:$4 sm:$0xff]  }
  0x88   :  { %v3156_v29 = vld [vmem:[%s4423_s0 + $0x374] ss:$20 sps:$4 sm:$0xff]   ;;  %v3158_v30 = vld [vmem:[%s4423_s0 + $0xfc] ss:$20 sps:$4 sm:$0xff]   ;;  %v3161_v32 = vld [vmem:[%s4423_s0 + $0xf8] ss:$20 sps:$4 sm:$0xff]  }
  0x89   :  { %1563 = vmatmul.mubr.bf16.gmra.mrb[36].mxu1 %v3129_v1  ;;  %1724 = vmatmul.mubr.bf16.gmra.mrb[4].mxu0 %v3130_v12  ;;  %v3160_v31 = vld [vmem:[%s4423_s0 + $0x370] ss:$20 sps:$4 sm:$0xff]   ;;  %v3166_v35 = vld [vmem:[%s4423_s0 + $0x398] ss:$20 sps:$4 sm:$0xff]   ;;  %v3167_v36 = vld [vmem:[%s4423_s0 + $0x120] ss:$20 sps:$4 sm:$0xff]  }
  0x8a   :  { %1570 = vmatprep.mubr.bf16.mxu1 %v3131_v13  ;;  %1731 = vmatprep.mubr.bf16.mxu0 %v3133_v14  ;;  %v3162_v33 = vld [vmem:[%s4423_s0 + $0x39c] ss:$20 sps:$4 sm:$0xff]   ;;  %v3164_v34 = vld [vmem:[%s4423_s0 + $0x124] ss:$20 sps:$4 sm:$0xff]   ;;  %v3170_v38 = vld [vmem:[%s4423_s0 + $0x14c] ss:$20 sps:$4 sm:$0xff]  }
  0x8b   :  { %v3168_v37 = vld [vmem:[%s4423_s0 + $0x3c4] ss:$20 sps:$4 sm:$0xff]   ;;  %v3172_v39 = vld [vmem:[%s4423_s0 + $0x3c0] ss:$20 sps:$4 sm:$0xff]   ;;  %v3173_v40 = vld [vmem:[%s4423_s0 + $0x148] ss:$20 sps:$4 sm:$0xff]  }
  0x8c   :  { %v3174_v41 = vld [vmem:[%s4423_s0 + $0x3ec] ss:$20 sps:$4 sm:$0xff]   ;;  %v3176_v42 = vld [vmem:[%s4423_s0 + $0x174] ss:$20 sps:$4 sm:$0xff]   ;;  %v3179_v44 = vld [vmem:[%s4423_s0 + $0x170] ss:$20 sps:$4 sm:$0xff]  }
  0x8d   :  { %v3178_v43 = vld [vmem:[%s4423_s0 + $0x3e8] ss:$20 sps:$4 sm:$0xff]   ;;  %v3184_v47 = vld [vmem:[%s4423_s0 + $0x410] ss:$20 sps:$4 sm:$0xff]   ;;  %v3185_v48 = vld [vmem:[%s4423_s0 + $0x198] ss:$20 sps:$4 sm:$0xff]  }
  0x8e   :  { %v3180_v45 = vld [vmem:[%s4423_s0 + $0x414] ss:$20 sps:$4 sm:$0xff]   ;;  %v3182_v46 = vld [vmem:[%s4423_s0 + $0x19c] ss:$20 sps:$4 sm:$0xff]   ;;  %v3189_v50 = vld [vmem:[%s4423_s0 + $0x1c4] ss:$20 sps:$4 sm:$0xff]  }
  0x8f   :  { %v3187_v49 = vld [vmem:[%s4423_s0 + $0x43c] ss:$20 sps:$4 sm:$0xff]   ;;  %v3191_v51 = vld [vmem:[%s4423_s0 + $0x438] ss:$20 sps:$4 sm:$0xff]   ;;  %v3192_v52 = vld [vmem:[%s4423_s0 + $0x1c0] ss:$20 sps:$4 sm:$0xff]  }
  0x90   :  { %v3193_v53 = vld [vmem:[%s4423_s0 + $0x464] ss:$20 sps:$4 sm:$0xff]   ;;  %v3195_v54 = vld [vmem:[%s4423_s0 + $0x1ec] ss:$20 sps:$4 sm:$0xff]   ;;  %v3198_v56 = vld [vmem:[%s4423_s0 + $0x1e8] ss:$20 sps:$4 sm:$0xff]  }
  0x91   :  { %1571 = vmatmul.mubr.bf16.gmra.mrb[40].mxu1 %v3135_v15  ;;  %1732 = vmatmul.mubr.bf16.gmra.mrb[8].mxu0 %v3136_v16  ;;  %v3197_v55 = vld [vmem:[%s4423_s0 + $0x460] ss:$20 sps:$4 sm:$0xff]   ;;  %v3203_v59 = vld [vmem:[%s4423_s0 + $0x488] ss:$20 sps:$4 sm:$0xff]   ;;  %v3204_v60 = vld [vmem:[%s4423_s0 + $0x210] ss:$20 sps:$4 sm:$0xff]  }
  0x92   :  { %1578 = vmatprep.mubr.bf16.mxu1 %v3137_v17  ;;  %1739 = vmatprep.mubr.bf16.mxu0 %v3139_v18  ;;  %v3199_v57 = vld [vmem:[%s4423_s0 + $0x48c] ss:$20 sps:$4 sm:$0xff]   ;;  %v3201_v58 = vld [vmem:[%s4423_s0 + $0x214] ss:$20 sps:$4 sm:$0xff]   ;;  %v3207_v62 = vld [vmem:[%s4423_s0 + $0x23c] ss:$20 sps:$4 sm:$0xff]  }
  0x93   :  { %v3205_v61 = vld [vmem:[%s4423_s0 + $0x4b4] ss:$20 sps:$4 sm:$0xff]   ;;  %v3209_v63 = vld [vmem:[%s4423_s0 + $0x4b0] ss:$20 sps:$4 sm:$0xff]   ;;  %v3210_v0 = vld [vmem:[%s4423_s0 + $0x238] ss:$20 sps:$4 sm:$0xff]  }
  0x94   :  { %v3211_v2 = vld [vmem:[%s4423_s0 + $0x4dc] ss:$20 sps:$4 sm:$0xff]   ;;  %v3213_v3 = vld [vmem:[%s4423_s0 + $0x264] ss:$20 sps:$4 sm:$0xff]   ;;  %v3216_v5 = vld [vmem:[%s4423_s0 + $0x260] ss:$20 sps:$4 sm:$0xff]  }
  0x95   :  { %v3215_v4 = vld [vmem:[%s4423_s0 + $0x4d8] ss:$20 sps:$4 sm:$0xff]   ;;  %v3219_v7 = vld [vmem:[%s4423_s0 + $0x10] ss:$20 sps:$4 sm:$0xff]   ;;  %vm1297_vm0 = vcmask 523264  }
  0x96   :  { %v3217_v6 = vld [vmem:[%s4423_s0 + $0x28c] ss:$20 sps:$4 sm:$0xff]   ;;  %v3220_v8 = vld [vmem:[%s4423_s0 + $0x288] ss:$20 sps:$4 sm:$0xff]   ;;  %v3225_v1 = vld [vmem:[%s4423_s0 + $0x2b0] ss:$20 sps:$4 sm:$0xff]  }
  0x97   :  { %v3221_v9 = vld [vmem:[%s4423_s0 + $0x38] ss:$20 sps:$4 sm:$0xff]   ;;  %v3222_v10 = vld [vmem:[%s4423_s0 + $0x2b4] ss:$20 sps:$4 sm:$0xff]   ;;  %v3227_v13 = vld [vmem:[%s4423_s0 + $0x2dc] ss:$20 sps:$4 sm:$0xff]  }
  0x98   :  { %v3224_v11 = vld [vmem:[%s4423_s0 + $0x60] ss:$20 sps:$4 sm:$0xff]   ;;  %v3226_v12 = vld [vmem:[%s4423_s0 + $0x88] ss:$20 sps:$4 sm:$0xff]   ;;  %v3229_v14 = vld [vmem:[%s4423_s0 + $0xb0] ss:$20 sps:$4 sm:$0xff]  }
  0x99   :  { %1579 = vmatmul.mubr.bf16.gmra.mrb[44].mxu1 %v3141_v19  ;;  %1740 = vmatmul.mubr.bf16.gmra.mrb[12].mxu0 %v3142_v20  ;;  %v3230_v15 = vld [vmem:[%s4423_s0 + $0x2d8] ss:$20 sps:$4 sm:$0xff]   ;;  %v3234_v18 = vld [vmem:[%s4423_s0 + $0x100] ss:$20 sps:$4 sm:$0xff]  }
  0x9a   :  { %1586 = vmatprep.mubr.bf16.mxu1 %v3143_v21  ;;  %1747 = vmatprep.mubr.bf16.mxu0 %v3145_v22  ;;  %v3231_v16 = vld [vmem:[%s4423_s0 + $0xd8] ss:$20 sps:$4 sm:$0xff]   ;;  %v3235_v21 = vld [vmem:[%s4423_s0 + $0x300] ss:$20 sps:$4 sm:$0xff]   ;;  %v3236_v22 = vld [vmem:[%s4423_s0 + $0x128] ss:$20 sps:$4 sm:$0xff]  }
  0x9b   :  { %v3232_v17 = vld [vmem:[%s4423_s0 + $0x304] ss:$20 sps:$4 sm:$0xff]  }
  0xa1   :  { %1587 = vmatmul.mubr.bf16.gmra.mrb[48].mxu1 %v3147_v23  ;;  %1748 = vmatmul.mubr.bf16.gmra.mrb[16].mxu0 %v3148_v24  ;;  %v3237_v24 = vld [vmem:[%s4423_s0 + $0x32c] ss:$20 sps:$4 sm:$0xff]  }
  0xa2   :  { %1594 = vmatprep.mubr.bf16.mxu1 %v3150_v25  ;;  %1755 = vmatprep.mubr.bf16.mxu0 %v3152_v26  ;;  %v3239_v25 = vld [vmem:[%s4423_s0 + $0x150] ss:$20 sps:$4 sm:$0xff]  }
  0xa9   :  { %1595 = vmatmul.mubr.bf16.gmra.mrb[52].mxu1 %v3154_v27  ;;  %1756 = vmatmul.mubr.bf16.gmra.mrb[20].mxu0 %v3155_v28 }
  0xaa   :  { %1602 = vmatprep.mubr.bf16.mxu1 %v3156_v29  ;;  %1763 = vmatprep.mubr.bf16.mxu0 %v3158_v30  ;;  %v3240_v29 = vld [vmem:[%s4423_s0 + $0x328] ss:$20 sps:$4 sm:$0xff]   ;;  %v3241_v30 = vld [vmem:[%s4423_s0 + $0x178] ss:$20 sps:$4 sm:$0xff]  }
  0xb1   :  { %1603 = vmatmul.mubr.bf16.gmra.mrb[56].mxu1 %v3160_v31  ;;  %1764 = vmatmul.mubr.bf16.gmra.mrb[24].mxu0 %v3161_v32  ;;  %v3242_v32 = vld [vmem:[%s4423_s0 + $0x354] ss:$20 sps:$4 sm:$0xff]  }
  0xb2   :  { %1610 = vmatprep.mubr.bf16.mxu1 %v3162_v33  ;;  %1771 = vmatprep.mubr.bf16.mxu0 %v3164_v34  ;;  %v3244_v33 = vld [vmem:[%s4423_s0 + $0x1a0] ss:$20 sps:$4 sm:$0xff]  }
  0xb9   :  { %1611 = vmatmul.mubr.bf16.gmra.mrb[60].mxu1 %v3166_v35  ;;  %1772 = vmatmul.mubr.bf16.gmra.mrb[28].mxu0 %v3167_v36 }
  0xba   :  { %1618 = vmatprep.mubr.bf16.mxu1 %v3168_v37  ;;  %1779 = vmatprep.mubr.bf16.mxu0 %v3170_v38  ;;  %v3245_v37 = vld [vmem:[%s4423_s0 + $0x350] ss:$20 sps:$4 sm:$0xff]   ;;  %v3246_v38 = vld [vmem:[%s4423_s0 + $0x1c8] ss:$20 sps:$4 sm:$0xff]  }
  0xc1   :  { %1619 = vmatmul.mubr.bf16.gmra.mrb[64].mxu1 %v3172_v39  ;;  %1780 = vmatmul.mubr.bf16.gmra.mrb[32].mxu0 %v3173_v40  ;;  %v3247_v40 = vld [vmem:[%s4423_s0 + $0x37c] ss:$20 sps:$4 sm:$0xff]  }
  0xc2   :  { %1626 = vmatprep.mubr.bf16.mxu1 %v3174_v41  ;;  %1787 = vmatprep.mubr.bf16.mxu0 %v3176_v42  ;;  %v3249_v41 = vld [vmem:[%s4423_s0 + $0x1f0] ss:$20 sps:$4 sm:$0xff]  }
  0xc9   :  { %1627 = vmatmul.mubr.bf16.gmra.mrb[68].mxu1 %v3178_v43  ;;  %1788 = vmatmul.mubr.bf16.gmra.mrb[36].mxu0 %v3179_v44 }
  0xca   :  { %1634 = vmatprep.mubr.bf16.mxu1 %v3180_v45  ;;  %1795 = vmatprep.mubr.bf16.mxu0 %v3182_v46  ;;  %v3250_v45 = vld [vmem:[%s4423_s0 + $0x378] ss:$20 sps:$4 sm:$0xff]  }
  0xcb   :  { %v3251_v46 = vld [vmem:[%s4423_s0 + $0x218] ss:$20 sps:$4 sm:$0xff]  }
  0xd1   :  { %1635 = vmatmul.mubr.bf16.gmra.mrb[72].mxu1 %v3184_v47  ;;  %1796 = vmatmul.mubr.bf16.gmra.mrb[40].mxu0 %v3185_v48  ;;  %v3252_v48 = vld [vmem:[%s4423_s0 + $0x3a4] ss:$20 sps:$4 sm:$0xff]  }
  0xd2   :  { %1642 = vmatprep.mubr.bf16.mxu1 %v3187_v49  ;;  %1803 = vmatprep.mubr.bf16.mxu0 %v3189_v50  ;;  %v3254_v49 = vld [vmem:[%s4423_s0 + $0x240] ss:$20 sps:$4 sm:$0xff]  }
  0xd9   :  { %1643 = vmatmul.mubr.bf16.gmra.mrb[76].mxu1 %v3191_v51  ;;  %1804 = vmatmul.mubr.bf16.gmra.mrb[44].mxu0 %v3192_v52 }
  0xda   :  { %1650 = vmatprep.mubr.bf16.mxu1 %v3193_v53  ;;  %1811 = vmatprep.mubr.bf16.mxu0 %v3195_v54  ;;  %v3255_v53 = vld [vmem:[%s4423_s0 + $0x3a0] ss:$20 sps:$4 sm:$0xff]   ;;  %v3256_v54 = vld [vmem:[%s4423_s0 + $0x268] ss:$20 sps:$4 sm:$0xff]  }
  0xe1   :  { %1651 = vmatmul.mubr.bf16.gmra.mrb[80].mxu1 %v3197_v55  ;;  %1812 = vmatmul.mubr.bf16.gmra.mrb[48].mxu0 %v3198_v56  ;;  %v3257_v56 = vld [vmem:[%s4423_s0 + $0x3cc] ss:$20 sps:$4 sm:$0xff]  }
  0xe2   :  { %1658 = vmatprep.mubr.bf16.mxu1 %v3199_v57  ;;  %1819 = vmatprep.mubr.bf16.mxu0 %v3201_v58  ;;  %v3259_v57 = vld [vmem:[%s4423_s0 + $0x290] ss:$20 sps:$4 sm:$0xff]  }
  0xe9   :  { %1659 = vmatmul.mubr.bf16.gmra.mrb[84].mxu1 %v3203_v59  ;;  %1820 = vmatmul.mubr.bf16.gmra.mrb[52].mxu0 %v3204_v60 }
  0xea   :  { %1666 = vmatprep.mubr.bf16.mxu1 %v3205_v61  ;;  %1827 = vmatprep.mubr.bf16.mxu0 %v3207_v62  ;;  %v3260_v61 = vld [vmem:[%s4423_s0 + $0x3c8] ss:$20 sps:$4 sm:$0xff]   ;;  %v3261_v62 = vld [vmem:[%s4423_s0 + $0x2b8] ss:$20 sps:$4 sm:$0xff]  }
  0xf1   :  { %1667 = vmatmul.mubr.bf16.gmra.mrb[88].mxu1 %v3209_v63  ;;  %1828 = vmatmul.mubr.bf16.gmra.mrb[56].mxu0 %v3210_v0  ;;  %v3262_v0 = vld [vmem:[%s4423_s0 + $0x3f4] ss:$20 sps:$4 sm:$0xff]  }
  0xf2   :  { %1674 = vmatprep.mubr.bf16.mxu1 %v3211_v2  ;;  %1835 = vmatprep.mubr.bf16.mxu0 %v3213_v3  ;;  %v3264_v2 = vld [vmem:[%s4423_s0 + $0x2e0] ss:$20 sps:$4 sm:$0xff]  }
  0xf9   :  { %1675 = vmatmul.mubr.bf16.gmra.mrb[92].mxu1 %v3215_v4  ;;  %1836 = vmatmul.mubr.bf16.gmra.mrb[60].mxu0 %v3216_v5 }
  0xfa   :  { %1843 = vmatprep.mubr.bf16.mxu0 %v3217_v6  ;;  %2854 = vmatprep.mubr.msk.bf16.mxu1 %vm1297_vm0, %v3219_v7  ;;  %v3265_v6 = vld [vmem:[%s4423_s0 + $0x3f0] ss:$20 sps:$4 sm:$0xff]   ;;  %v3266_v7 = vld [vmem:[%s4423_s0 + $0x308] ss:$20 sps:$4 sm:$0xff]  }
 0x101   :  { %1844 = vmatmul.mubr.bf16.gmra.mrb[64].mxu0 %v3220_v8  ;;  %2855 = vmatmul.mubr.msk.bf16.vlgmr.msra.gmra.mrb[96].mxu1 %vm1297_vm0, %v3221_v9  ;;  %v3267_v9 = vld [vmem:[%s4423_s0 + $0x41c] ss:$20 sps:$4 sm:$0xff]  }
 0x102   :  { %1851 = vmatprep.mubr.bf16.mxu0 %v3222_v10  ;;  %2858 = vmatprep.mubr.msk.bf16.mxu1 %vm1297_vm0, %v3224_v11  ;;  %v3269_v10 = vld [vmem:[%s4423_s0 + $0x330] ss:$20 sps:$4 sm:$0xff]  }
 0x109   :  { %1852 = vmatmul.mubr.bf16.gmra.mrb[68].mxu0 %v3225_v1  ;;  %2859 = vmatmul.mubr.msk.bf16.gmra.mrb[100].mxu1 %vm1297_vm0, %v3226_v12 }
 0x10a   :  { %1859 = vmatprep.mubr.bf16.mxu0 %v3227_v13  ;;  %2862 = vmatprep.mubr.msk.bf16.mxu1 %vm1297_vm0, %v3229_v14  ;;  %v3270_v13 = vld [vmem:[%s4423_s0 + $0x418] ss:$20 sps:$4 sm:$0xff]  }
 0x10b   :  { %v3271_v14 = vld [vmem:[%s4423_s0 + $0x358] ss:$20 sps:$4 sm:$0xff]  }
 0x111   :  { %1860 = vmatmul.mubr.bf16.gmra.mrb[72].mxu0 %v3230_v15  ;;  %2863 = vmatmul.mubr.msk.bf16.gmra.mrb[104].mxu1 %vm1297_vm0, %v3231_v16  ;;  %v3272_v16 = vld [vmem:[%s4423_s0 + $0x444] ss:$20 sps:$4 sm:$0xff]  }
 0x112   :  { %1867 = vmatprep.mubr.bf16.mxu0 %v3232_v17  ;;  %2866 = vmatprep.mubr.msk.bf16.mxu1 %vm1297_vm0, %v3234_v18  ;;  %v3274_v17 = vld [vmem:[%s4423_s0 + $0x380] ss:$20 sps:$4 sm:$0xff]  }
 0x114   :  { %v3892_v19 = vpop.f32.mrb[0].mxu1 }
 0x115   :  { %v1494_v20 = vpop.f32.mrb[1].mxu1 }
 0x116   :  { %v3900_v23 = vpop.f32.mrb[2].mxu1 }
 0x117   :  { %v1497_v26 = vpop.f32.mrb[3].mxu1 }
 0x118   :  { %v3276_v26 = vld [vmem:[%s4423_s0 + $0x3a8] ss:$20 sps:$4 sm:$0xff]  }
 0x119   :  { %1868 = vmatmul.mubr.bf16.gmra.mrb[76].mxu0 %v3235_v21  ;;  %2867 = vmatmul.mubr.msk.bf16.gmra.mrb[108].mxu1 %vm1297_vm0, %v3236_v22 }
 0x11a   :  { %1875 = vmatprep.mubr.bf16.mxu0 %v3237_v24  ;;  %2870 = vmatprep.mubr.msk.bf16.mxu1 %vm1297_vm0, %v3239_v25  ;;  %v3275_v25 = vld [vmem:[%s4423_s0 + $0x440] ss:$20 sps:$4 sm:$0xff]  }
 0x11c   :  { %v3910_v27 = vpop.f32.mrb[4].mxu1 }
 0x11d   :  { %v1502_v28 = vpop.f32.mrb[5].mxu1 }
 0x11e   :  { %v3918_v31 = vpop.f32.mrb[6].mxu1 }
 0x11f   :  { %v1505_v34 = vpop.f32.mrb[7].mxu1 }
 0x121   :  { %1876 = vmatmul.mubr.bf16.gmra.mrb[80].mxu0 %v3240_v29  ;;  %2871 = vmatmul.mubr.msk.bf16.gmra.mrb[112].mxu1 %vm1297_vm0, %v3241_v30  ;;  %v3277_v30 = vld [vmem:[%s4423_s0 + $0x46c] ss:$20 sps:$4 sm:$0xff]  }
 0x122   :  { %1883 = vmatprep.mubr.bf16.mxu0 %v3242_v32  ;;  %2874 = vmatprep.mubr.msk.bf16.mxu1 %vm1297_vm0, %v3244_v33  ;;  %v3279_v32 = vld [vmem:[%s4423_s0 + $0x3d0] ss:$20 sps:$4 sm:$0xff]  }
 0x124   :  { %v3928_v35 = vpop.f32.mrb[8].mxu1 }
 0x125   :  { %v1510_v36 = vpop.f32.mrb[9].mxu1 }
 0x126   :  { %v3936_v39 = vpop.f32.mrb[10].mxu1 }
 0x127   :  { %v1513_v42 = vpop.f32.mrb[11].mxu1 }
 0x128   :  { %v3281_v42 = vld [vmem:[%s4423_s0 + $0x3f8] ss:$20 sps:$4 sm:$0xff]  }
 0x129   :  { %1884 = vmatmul.mubr.bf16.gmra.mrb[84].mxu0 %v3245_v37  ;;  %2875 = vmatmul.mubr.msk.bf16.gmra.mrb[116].mxu1 %vm1297_vm0, %v3246_v38 }
 0x12a   :  { %1891 = vmatprep.mubr.bf16.mxu0 %v3247_v40  ;;  %2878 = vmatprep.mubr.msk.bf16.mxu1 %vm1297_vm0, %v3249_v41  ;;  %v3280_v41 = vld [vmem:[%s4423_s0 + $0x468] ss:$20 sps:$4 sm:$0xff]  }
 0x12c   :  { %v3946_v43 = vpop.f32.mrb[12].mxu1 }
 0x12d   :  { %v1518_v44 = vpop.f32.mrb[13].mxu1 }
 0x12e   :  { %v3954_v47 = vpop.f32.mrb[14].mxu1 }
 0x12f   :  { %v1521_v50 = vpop.f32.mrb[15].mxu1 }
 0x131   :  { %1892 = vmatmul.mubr.bf16.gmra.mrb[88].mxu0 %v3250_v45  ;;  %2879 = vmatmul.mubr.msk.bf16.gmra.mrb[120].mxu1 %vm1297_vm0, %v3251_v46  ;;  %v3282_v46 = vld [vmem:[%s4423_s0 + $0x494] ss:$20 sps:$4 sm:$0xff]  }
 0x132   :  { %1899 = vmatprep.mubr.bf16.mxu0 %v3252_v48  ;;  %2882 = vmatprep.mubr.msk.bf16.mxu1 %vm1297_vm0, %v3254_v49  ;;  %v3284_v48 = vld [vmem:[%s4423_s0 + $0x420] ss:$20 sps:$4 sm:$0xff]  }
 0x134   :  { %v3964_v51 = vpop.f32.mrb[16].mxu1 }
 0x135   :  { %v1526_v52 = vpop.f32.mrb[17].mxu1 }
 0x136   :  { %v3972_v55 = vpop.f32.mrb[18].mxu1 }
 0x137   :  { %v1529_v58 = vpop.f32.mrb[19].mxu1 }
 0x138   :  { %v3286_v58 = vld [vmem:[%s4423_s0 + $0x448] ss:$20 sps:$4 sm:$0xff]  }
 0x139   :  { %1900 = vmatmul.mubr.bf16.gmra.mrb[92].mxu0 %v3255_v53  ;;  %2883 = vmatmul.mubr.msk.bf16.gmra.mrb[124].mxu1 %vm1297_vm0, %v3256_v54 }
 0x13a   :  { %1907 = vmatprep.mubr.bf16.mxu0 %v3257_v56  ;;  %2886 = vmatprep.mubr.msk.bf16.mxu1 %vm1297_vm0, %v3259_v57  ;;  %v3285_v57 = vld [vmem:[%s4423_s0 + $0x490] ss:$20 sps:$4 sm:$0xff]  }
 0x13c   :  { %v3982_v59 = vpop.f32.mrb[20].mxu1 }
 0x13d   :  { %v1534_v60 = vpop.f32.mrb[21].mxu1 }
 0x13e   :  { %v3990_v63 = vpop.f32.mrb[22].mxu1 }
 0x13f   :  { %v1537_v3 = vpop.f32.mrb[23].mxu1 }
 0x141   :  { %1908 = vmatmul.mubr.bf16.gmra.mrb[96].mxu0 %v3260_v61  ;;  %2887 = vmatmul.mubr.msk.bf16.gmra.mrb[128].mxu1 %vm1297_vm0, %v3261_v62  ;;  %v3287_v62 = vld [vmem:[%s4423_s0 + $0x4bc] ss:$20 sps:$4 sm:$0xff]  }
 0x142   :  { %1915 = vmatprep.mubr.bf16.mxu0 %v3262_v0  ;;  %2890 = vmatprep.mubr.msk.bf16.mxu1 %vm1297_vm0, %v3264_v2  ;;  %v3289_v0 = vld [vmem:[%s4423_s0 + $0x470] ss:$20 sps:$4 sm:$0xff]  }
 0x144   :  { %v4000_v4 = vpop.f32.mrb[24].mxu1 }
 0x145   :  { %v1542_v5 = vpop.f32.mrb[25].mxu1 }
 0x146   :  { %v4008_v8 = vpop.f32.mrb[26].mxu1 }
 0x147   :  { %v1545_v11 = vpop.f32.mrb[27].mxu1 }
 0x148   :  { %v3291_v11 = vld [vmem:[%s4423_s0 + $0x498] ss:$20 sps:$4 sm:$0xff]  }
 0x149   :  { %1916 = vmatmul.mubr.bf16.gmra.mrb[100].mxu0 %v3265_v6  ;;  %2891 = vmatmul.mubr.msk.bf16.gmra.mrb[132].mxu1 %vm1297_vm0, %v3266_v7 }
 0x14a   :  { %1923 = vmatprep.mubr.bf16.mxu0 %v3267_v9  ;;  %2894 = vmatprep.mubr.msk.bf16.mxu1 %vm1297_vm0, %v3269_v10  ;;  %v3290_v10 = vld [vmem:[%s4423_s0 + $0x4b8] ss:$20 sps:$4 sm:$0xff]  }
 0x14c   :  { %v4018_v1 = vpop.f32.mrb[28].mxu1 }
 0x14d   :  { %v1550_v12 = vpop.f32.mrb[29].mxu1 }
 0x14e   :  { %v4026_v15 = vpop.f32.mrb[30].mxu1 }
 0x14f   :  { %v1553_v18 = vpop.f32.mrb[31].mxu1 }
 0x151   :  { %1924 = vmatmul.mubr.bf16.gmra.mrb[104].mxu0 %v3270_v13  ;;  %2895 = vmatmul.mubr.msk.bf16.gmra.mrb[136].mxu1 %vm1297_vm0, %v3271_v14  ;;  %v3292_v14 = vld [vmem:[%s4423_s0 + $0x4e4] ss:$20 sps:$4 sm:$0xff]  }
 0x152   :  { %1931 = vmatprep.mubr.bf16.mxu0 %v3272_v16  ;;  %2898 = vmatprep.mubr.msk.bf16.mxu1 %vm1297_vm0, %v3274_v17  ;;  %v3294_v16 = vld [vmem:[%s4423_s0 + $0x4c0] ss:$20 sps:$4 sm:$0xff]  }
 0x154   :  { %v4036_v20 = vpop.f32.mrb[32].mxu1  ;;  %v4038_v21 = vpop.f32.mrb[0].mxu0 }
 0x155   :  { %v1558_v22 = vpop.f32.mrb[33].mxu1  ;;  %v1719_v24 = vpop.f32.mrb[1].mxu0 }
 0x156   :  { %v4046_v28 = vpop.f32.mrb[34].mxu1  ;;  %v4048_v29 = vpop.f32.mrb[2].mxu0 }
 0x157   :  { %v1561_v33 = vpop.f32.mrb[35].mxu1  ;;  %v1722_v34 = vpop.f32.mrb[3].mxu0 }
 0x159   :  { %1932 = vmatmul.mubr.bf16.gmra.mrb[108].mxu0 %v3275_v25  ;;  %2899 = vmatmul.mubr.msk.bf16.gmra.mrb[140].mxu1 %vm1297_vm0, %v3276_v26 }
 0x15a   :  { %1939 = vmatprep.mubr.bf16.mxu0 %v3277_v30  ;;  %2902 = vmatprep.mubr.msk.bf16.mxu1 %vm1297_vm0, %v3279_v32  ;;  %v3295_v30 = vld [vmem:[%s4423_s0 + $0x4e0] ss:$20 sps:$4 sm:$0xff]   ;;  %v3296_v32 = vld [vmem:[%s4423_s0 + $0x4e8] ss:$20 sps:$4 sm:$0xff]   ;;  %s3369_s0 = smov [#allocation2]  }
 0x15b   :  { %s2544_s7 = sshll.u32 %s3369_s0, 4  ;;  %s2545_s7 = int_to_ptr.vmem [resolvable:$true] %s2544_s7 }
 0x15c   :  { %v4058_v36 = vpop.f32.mrb[36].mxu1  ;;  %v4060_v37 = vpop.f32.mrb[4].mxu0  ;;  %s3297_s8 = scalar_lea.vmem %s2545_s7, 8192  ;;  %p3302_p1 = scmp.lt.s32.totalorder %s2545_s7, %s2545_s7 }
 0x15d   :  { %v1566_v38 = vpop.f32.mrb[37].mxu1  ;;  %v1727_v40 = vpop.f32.mrb[5].mxu0  ;;  %p3298_p0 = scmp.ne.s32.totalorder %s2545_s7, %s3297_s8  ;;  %p3303_p2 = scmp.lt.s32.totalorder %s3297_s8, %s3297_s8 }
 0x15e   :  { %v4068_v44 = vpop.f32.mrb[38].mxu1  ;;  %v4070_v45 = vpop.f32.mrb[6].mxu0 }
 0x15f   :  { %v1569_v49 = vpop.f32.mrb[39].mxu1  ;;  %v1730_v50 = vpop.f32.mrb[7].mxu0  ;;  %p3304_p3 = por %p3303_p2, %p3302_p1 }
 0x161   :  { %1940 = vmatmul.mubr.bf16.gmra.mrb[112].mxu0 %v3280_v41  ;;  %2903 = vmatmul.mubr.msk.bf16.gmra.mrb[144].mxu1 %vm1297_vm0, %v3281_v42  ;;  %p3305_p4 = pnand %p3304_p3, %p3298_p0 }
 0x162   :  { %1947 = vmatprep.mubr.bf16.mxu0 %v3282_v46  ;;  %2906 = vmatprep.mubr.msk.bf16.mxu1 %vm1297_vm0, %v3284_v48 }
 0x164   :  { %v4080_v52 = vpop.f32.mrb[40].mxu1  ;;  %v4082_v53 = vpop.f32.mrb[8].mxu0 }
 0x165   :  { %v1574_v54 = vpop.f32.mrb[41].mxu1  ;;  %v1735_v56 = vpop.f32.mrb[9].mxu0 }
 0x166   :  { %v4090_v60 = vpop.f32.mrb[42].mxu1  ;;  %v4092_v61 = vpop.f32.mrb[10].mxu0 }
 0x167   :  { %v1577_v2 = vpop.f32.mrb[43].mxu1  ;;  %v1738_v3 = vpop.f32.mrb[11].mxu0 }
 0x169   :  { %1948 = vmatmul.mubr.bf16.gmra.mrb[116].mxu0 %v3285_v57  ;;  %2907 = vmatmul.mubr.msk.bf16.gmra.mrb[148].mxu1 %vm1297_vm0, %v3286_v58 }
 0x16a   :  { %1955 = vmatprep.mubr.bf16.mxu0 %v3287_v62  ;;  %2910 = vmatprep.mubr.msk.bf16.mxu1 %vm1297_vm0, %v3289_v0 }
 0x16c   :  { %v4102_v5 = vpop.f32.mrb[44].mxu1  ;;  %v4104_v6 = vpop.f32.mrb[12].mxu0 }
 0x16d   :  { %v1582_v7 = vpop.f32.mrb[45].mxu1  ;;  %v1743_v9 = vpop.f32.mrb[13].mxu0 }
 0x16e   :  { %v4112_v12 = vpop.f32.mrb[46].mxu1  ;;  %v4114_v13 = vpop.f32.mrb[14].mxu0 }
 0x16f   :  { %v1585_v17 = vpop.f32.mrb[47].mxu1  ;;  %v1746_v18 = vpop.f32.mrb[15].mxu0 }
 0x171   :  { %1956 = vmatmul.mubr.bf16.gmra.mrb[120].mxu0 %v3290_v10  ;;  %2911 = vmatmul.mubr.msk.bf16.gmra.mrb[152].mxu1 %vm1297_vm0, %v3291_v11 }
 0x172   :  { %1963 = vmatprep.mubr.bf16.mxu0 %v3292_v14  ;;  %2914 = vmatprep.mubr.msk.bf16.mxu1 %vm1297_vm0, %v3294_v16 }
 0x174   :  { %v4124_v22 = vpop.f32.mrb[48].mxu1  ;;  %v4126_v24 = vpop.f32.mrb[16].mxu0 }
 0x175   :  { %v1590_v25 = vpop.f32.mrb[49].mxu1  ;;  %v1751_v26 = vpop.f32.mrb[17].mxu0 }
 0x176   :  { %v4134_v33 = vpop.f32.mrb[50].mxu1  ;;  %v4136_v34 = vpop.f32.mrb[18].mxu0 }
 0x177   :  { %v1593_v38 = vpop.f32.mrb[51].mxu1  ;;  %v1754_v40 = vpop.f32.mrb[19].mxu0 }
 0x179   :  { %1964 = vmatmul.mubr.bf16.gmra.mrb[124].mxu0 %v3295_v30  ;;  %2915 = vmatmul.mubr.msk.bf16.gmra.mrb[156].mxu1 %vm1297_vm0, %v3296_v32 }
 0x17c   :  { %v4139_v41 = vpop.f32.mrb[52].mxu1  ;;  %v4141_v42 = vpop.f32.mrb[20].mxu0 }
 0x17d   :  { %v1598_v46 = vpop.f32.mrb[53].mxu1  ;;  %v1759_v48 = vpop.f32.mrb[21].mxu0 }
 0x17e   :  { %v4143_v49 = vpop.f32.mrb[54].mxu1  ;;  %v4145_v50 = vpop.f32.mrb[22].mxu0 }
 0x17f   :  { %v1601_v54 = vpop.f32.mrb[55].mxu1  ;;  %v1762_v56 = vpop.f32.mrb[23].mxu0 }
 0x184   :  { %v4147_v57 = vpop.f32.mrb[56].mxu1  ;;  %v4149_v58 = vpop.f32.mrb[24].mxu0 }
 0x185   :  { %v1606_v62 = vpop.f32.mrb[57].mxu1  ;;  %v1767_v0 = vpop.f32.mrb[25].mxu0 }
 0x186   :  { %v4151_v2 = vpop.f32.mrb[58].mxu1  ;;  %v4153_v3 = vpop.f32.mrb[26].mxu0 }
 0x187   :  { %v1609_v7 = vpop.f32.mrb[59].mxu1  ;;  %v1770_v9 = vpop.f32.mrb[27].mxu0 }
 0x18c   :  { %v4155_v10 = vpop.f32.mrb[60].mxu1  ;;  %v4157_v11 = vpop.f32.mrb[28].mxu0 }
 0x18d   :  { %v1614_v14 = vpop.f32.mrb[61].mxu1  ;;  %v1775_v16 = vpop.f32.mrb[29].mxu0 }
 0x18e   :  { %v4159_v17 = vpop.f32.mrb[62].mxu1  ;;  %v4161_v18 = vpop.f32.mrb[30].mxu0 }
 0x18f   :  { %v1617_v25 = vpop.f32.mrb[63].mxu1  ;;  %v1778_v26 = vpop.f32.mrb[31].mxu0 }
 0x194   :  { %v4163_v30 = vpop.f32.mrb[64].mxu1  ;;  %v1781_v32 = vpop.f32.mrb[32].mxu0 }
 0x195   :  { %v4166_v38 = vadd.f32 %v1781_v32, %v3892_v19  ;;  %v1622_v40 = vpop.f32.mrb[65].mxu1  ;;  %v1783_v46 = vpop.f32.mrb[33].mxu0 }
 0x196   :  { %v4168_v48 = vpop.f32.mrb[66].mxu1  ;;  %v1784_v54 = vpop.f32.mrb[34].mxu0 }
 0x197   :  { %4428 = vst [vmem:[#allocation9_spill] sm:$0xff] %v4168_v48  ;;  %v4171_v56 = vadd.f32 %v1784_v54, %v3900_v23  ;;  %v1625_v62 = vpop.f32.mrb[67].mxu1  ;;  %v1786_v0 = vpop.f32.mrb[35].mxu0 }
 0x19c   :  { %v4173_v7 = vpop.f32.mrb[68].mxu1  ;;  %v1789_v9 = vpop.f32.mrb[36].mxu0 }
 0x19d   :  { %4429 = vst [vmem:[#allocation10_spill] sm:$0xff] %v4173_v7  ;;  %v4176_v14 = vadd.f32 %v1789_v9, %v3910_v27  ;;  %v1630_v16 = vpop.f32.mrb[69].mxu1  ;;  %v1791_v25 = vpop.f32.mrb[37].mxu0 }
 0x19e   :  { %v4178_v19 = vpop.f32.mrb[70].mxu1  ;;  %v1792_v26 = vpop.f32.mrb[38].mxu0 }
 0x19f   :  { %4430 = vst [vmem:[#allocation11_spill] sm:$0xff] %v4178_v19  ;;  %v4181_v32 = vadd.f32 %v1792_v26, %v3918_v31  ;;  %v1633_v40 = vpop.f32.mrb[71].mxu1  ;;  %v1794_v46 = vpop.f32.mrb[39].mxu0 }
 0x1a4   :  { %v4183_v23 = vpop.f32.mrb[72].mxu1  ;;  %v1797_v54 = vpop.f32.mrb[40].mxu0 }
 0x1a5   :  { %4431 = vst [vmem:[#allocation12_spill] sm:$0xff] %v4183_v23  ;;  %v4186_v62 = vadd.f32 %v1797_v54, %v3928_v35  ;;  %v1638_v0 = vpop.f32.mrb[73].mxu1  ;;  %v1799_v7 = vpop.f32.mrb[41].mxu0 }
 0x1a6   :  { %v4188_v27 = vpop.f32.mrb[74].mxu1  ;;  %v1800_v9 = vpop.f32.mrb[42].mxu0 }
 0x1a7   :  { %4432 = vst [vmem:[#allocation13_spill] sm:$0xff] %v4188_v27  ;;  %v4191_v16 = vadd.f32 %v1800_v9, %v3936_v39  ;;  %v1641_v25 = vpop.f32.mrb[75].mxu1  ;;  %v1802_v19 = vpop.f32.mrb[43].mxu0 }
 0x1ac   :  { %v4193_v31 = vpop.f32.mrb[76].mxu1  ;;  %v1805_v26 = vpop.f32.mrb[44].mxu0 }
 0x1ad   :  { %4433 = vst [vmem:[#allocation14_spill] sm:$0xff] %v4193_v31  ;;  %v4196_v40 = vadd.f32 %v1805_v26, %v3946_v43  ;;  %v1646_v46 = vpop.f32.mrb[77].mxu1  ;;  %v1807_v23 = vpop.f32.mrb[45].mxu0 }
 0x1ae   :  { %v4198_v35 = vpop.f32.mrb[78].mxu1  ;;  %v1808_v54 = vpop.f32.mrb[46].mxu0 }
 0x1af   :  { %4434 = vst [vmem:[#allocation15_spill] sm:$0xff] %v4198_v35  ;;  %v4201_v7 = vadd.f32 %v1808_v54, %v3954_v47  ;;  %v1649_v0 = vpop.f32.mrb[79].mxu1  ;;  %v1810_v27 = vpop.f32.mrb[47].mxu0 }
 0x1b4   :  { %v4203_v39 = vpop.f32.mrb[80].mxu1  ;;  %v1813_v9 = vpop.f32.mrb[48].mxu0 }
 0x1b5   :  { %4435 = vst [vmem:[#allocation16_spill] sm:$0xff] %v4203_v39  ;;  %v4206_v19 = vadd.f32 %v1813_v9, %v3964_v51  ;;  %v1654_v25 = vpop.f32.mrb[81].mxu1  ;;  %v1815_v31 = vpop.f32.mrb[49].mxu0 }
 0x1b6   :  { %v4208_v43 = vpop.f32.mrb[82].mxu1  ;;  %v1816_v26 = vpop.f32.mrb[50].mxu0 }
 0x1b7   :  { %4436 = vst [vmem:[#allocation17_spill] sm:$0xff] %v4208_v43  ;;  %v4211_v23 = vadd.f32 %v1816_v26, %v3972_v55  ;;  %v1657_v46 = vpop.f32.mrb[83].mxu1  ;;  %v1818_v35 = vpop.f32.mrb[51].mxu0 }
 0x1bc   :  { %v4213_v47 = vpop.f32.mrb[84].mxu1  ;;  %v1821_v54 = vpop.f32.mrb[52].mxu0 }
 0x1bd   :  { %4437 = vst [vmem:[#allocation18_spill] sm:$0xff] %v4213_v47  ;;  %v4216_v27 = vadd.f32 %v1821_v54, %v3982_v59  ;;  %v1662_v0 = vpop.f32.mrb[85].mxu1  ;;  %v1823_v39 = vpop.f32.mrb[53].mxu0 }
 0x1be   :  { %v4218_v51 = vpop.f32.mrb[86].mxu1  ;;  %v1824_v9 = vpop.f32.mrb[54].mxu0 }
 0x1bf   :  { %4438 = vst [vmem:[#allocation19_spill] sm:$0xff] %v4218_v51  ;;  %v4221_v31 = vadd.f32 %v1824_v9, %v3990_v63  ;;  %v1665_v25 = vpop.f32.mrb[87].mxu1  ;;  %v1826_v43 = vpop.f32.mrb[55].mxu0 }
 0x1c4   :  { %v4223_v55 = vpop.f32.mrb[88].mxu1  ;;  %v1829_v26 = vpop.f32.mrb[56].mxu0 }
 0x1c5   :  { %4439 = vst [vmem:[#allocation20_spill] sm:$0xff] %v4223_v55  ;;  %v4226_v35 = vadd.f32 %v1829_v26, %v4000_v4  ;;  %v1670_v46 = vpop.f32.mrb[89].mxu1  ;;  %v1831_v47 = vpop.f32.mrb[57].mxu0 }
 0x1c6   :  { %v4228_v59 = vpop.f32.mrb[90].mxu1  ;;  %v1832_v54 = vpop.f32.mrb[58].mxu0 }
 0x1c7   :  { %4440 = vst [vmem:[#allocation21_spill] sm:$0xff] %v4228_v59  ;;  %v4231_v39 = vadd.f32 %v1832_v54, %v4008_v8  ;;  %v1673_v0 = vpop.f32.mrb[91].mxu1  ;;  %v1834_v51 = vpop.f32.mrb[59].mxu0 }
 0x1cc   :  { %v4233_v63 = vpop.f32.mrb[92].mxu1  ;;  %v1837_v9 = vpop.f32.mrb[60].mxu0 }
 0x1cd   :  { %4441 = vst [vmem:[#allocation22_spill] sm:$0xff] %v4233_v63  ;;  %v4236_v43 = vadd.f32 %v1837_v9, %v4018_v1  ;;  %v1678_v25 = vpop.f32.mrb[93].mxu1  ;;  %v1839_v55 = vpop.f32.mrb[61].mxu0 }
 0x1ce   :  { %v4238_v4 = vpop.f32.mrb[94].mxu1  ;;  %v1840_v26 = vpop.f32.mrb[62].mxu0 }
 0x1cf   :  { %4442 = vst [vmem:[#allocation23_spill] sm:$0xff] %v4238_v4  ;;  %v4241_v47 = vadd.f32 %v1840_v26, %v4026_v15  ;;  %v1681_v46 = vpop.f32.mrb[95].mxu1  ;;  %v1842_v59 = vpop.f32.mrb[63].mxu0 }
 0x1d0   :  { %v3368_v46 = vmov 0.0  }
 0x1d1   :  { %2329 = vst [vmem:[#allocation4] sm:$0x1] %v3368_v46  ;;  %2330 = vst [vmem:[#allocation6] sm:$0x1] %v3368_v46 }
 0x1d4   :  { %v1845_v8 = vpop.f32.mrb[64].mxu0  ;;  %v2856_v54 = vpop.f32.mrb[96].mxu1 }
 0x1d5   :  { %v4244_v51 = vadd.f32 %v1845_v8, %v4036_v20  ;;  %v2015_v0 = vadd.f32 %v2856_v54, %v4060_v37  ;;  %v1847_v63 = vpop.f32.mrb[65].mxu0  ;;  %v2006_v1 = vpop.f32.mrb[97].mxu1 }
 0x1d6   :  { %v2007_v9 = vadd.f32 %v2006_v1, %v4038_v21  ;;  %v1848_v55 = vpop.f32.mrb[66].mxu0  ;;  %v2857_v25 = vpop.f32.mrb[98].mxu1 }
 0x1d7   :  { %4443 = vst [vmem:[#allocation24_spill] sm:$0xff] %v4244_v51  ;;  %2263 = vst [vmem:[#allocation2 + $0x10] sm:$0xff] %v2015_v0  ;;  %v4249_v4 = vadd.f32 %v1848_v55, %v4046_v28  ;;  %v2018_v15 = vadd.f32 %v2857_v25, %v4070_v45  ;;  %v2009_v59 = vpop.f32.mrb[99].mxu1  ;;  %v1850_v26 = vpop.f32.mrb[67].mxu0  ;;  %v2406_v8 = vmul.f32 %v2015_v0, %v2015_v0 }
 0x1d8   :  { %2261 = vst [vmem:[#allocation2] sm:$0xff] %v2007_v9  ;;  %v2010_v20 = vadd.f32 %v2009_v59, %v4048_v29  ;;  %v2404_v37 = vmul.f32 %v2007_v9, %v2007_v9 }
 0x1d9   :  { %4444 = vst [vmem:[#allocation25_spill] sm:$0xff] %v4249_v4  ;;  %2264 = vst [vmem:[#allocation2 + $0x18] sm:$0xff] %v2018_v15  ;;  %v2407_v59 = vmul.f32 %v2018_v15, %v2018_v15 }
 0x1da   :  { %2262 = vst [vmem:[#allocation2 + $0x8] sm:$0xff] %v2010_v20  ;;  %v2332_v21 = vadd.f32 %v2010_v20, %v2007_v9  ;;  %v2405_v63 = vmul.f32 %v2010_v20, %v2010_v20 }
 0x1dc   :  { %v2333_v54 = vadd.f32 %v2332_v21, %v2015_v0  ;;  %v2468_v1 = vadd.f32 %v2405_v63, %v2404_v37  ;;  %v1853_v28 = vpop.f32.mrb[68].mxu0  ;;  %v2860_v55 = vpop.f32.mrb[100].mxu1 }
 0x1dd   :  { %v4254_v45 = vadd.f32 %v1853_v28, %v4058_v36  ;;  %v2031_v25 = vadd.f32 %v2860_v55, %v4104_v6  ;;  %v1855_v26 = vpop.f32.mrb[69].mxu0  ;;  %v2022_v29 = vpop.f32.mrb[101].mxu1 }
 0x1de   :  { %v2334_v4 = vadd.f32 %v2333_v54, %v2018_v15  ;;  %v2469_v48 = vadd.f32 %v2468_v1, %v2406_v8  ;;  %v2023_v46 = vadd.f32 %v2022_v29, %v4082_v53  ;;  %v1856_v51 = vpop.f32.mrb[70].mxu0  ;;  %v2861_v9 = vpop.f32.mrb[102].mxu1 }
 0x1df   :  { %2267 = vst [vmem:[#allocation2 + $0x30] sm:$0xff] %v2031_v25  ;;  %v4259_v0 = vadd.f32 %v1856_v51, %v4068_v44  ;;  %v2034_v20 = vadd.f32 %v2861_v9, %v4114_v13  ;;  %v2025_v37 = vpop.f32.mrb[103].mxu1  ;;  %v1858_v36 = vpop.f32.mrb[71].mxu0  ;;  %v2410_v54 = vmul.f32 %v2031_v25, %v2031_v25 }
 0x1e0   :  { %v2470_v21 = vadd.f32 %v2469_v48, %v2407_v59  ;;  %2265 = vst [vmem:[#allocation2 + $0x20] sm:$0xff] %v2023_v46  ;;  %v2335_v6 = vadd.f32 %v2334_v4, %v2023_v46  ;;  %v2408_v63 = vmul.f32 %v2023_v46, %v2023_v46  ;;  %v2026_v28 = vadd.f32 %v2025_v37, %v4092_v61 }
 0x1e1   :  { %2268 = vst [vmem:[#allocation2 + $0x38] sm:$0xff] %v2034_v20  ;;  %v2411_v29 = vmul.f32 %v2034_v20, %v2034_v20 }
 0x1e2   :  { %v2471_v15 = vadd.f32 %v2470_v21, %v2408_v63  ;;  %2266 = vst [vmem:[#allocation2 + $0x28] sm:$0xff] %v2026_v28  ;;  %v2336_v53 = vadd.f32 %v2335_v6, %v2026_v28  ;;  %v2409_v8 = vmul.f32 %v2026_v28, %v2026_v28 }
 0x1e4   :  { %v2337_v1 = vadd.f32 %v2336_v53, %v2031_v25  ;;  %v2472_v55 = vadd.f32 %v2471_v15, %v2409_v8  ;;  %v1861_v44 = vpop.f32.mrb[72].mxu0  ;;  %v2864_v51 = vpop.f32.mrb[104].mxu1 }
 0x1e5   :  { %v4264_v13 = vadd.f32 %v1861_v44, %v4080_v52  ;;  %v2047_v48 = vadd.f32 %v2864_v51, %v4141_v42  ;;  %v1863_v26 = vpop.f32.mrb[73].mxu0  ;;  %v2038_v4 = vpop.f32.mrb[105].mxu1 }
 0x1e6   :  { %v2473_v59 = vadd.f32 %v2472_v55, %v2410_v54  ;;  %v2039_v61 = vadd.f32 %v2038_v4, %v4126_v24  ;;  %v2338_v46 = vadd.f32 %v2337_v1, %v2034_v20  ;;  %v1864_v9 = vpop.f32.mrb[74].mxu0  ;;  %v2865_v37 = vpop.f32.mrb[106].mxu1 }
 0x1e7   :  { %2271 = vst [vmem:[#allocation2 + $0x50] sm:$0xff] %v2047_v48  ;;  %v4269_v25 = vadd.f32 %v1864_v9, %v4090_v60  ;;  %v2050_v36 = vadd.f32 %v2865_v37, %v4145_v50  ;;  %v2041_v21 = vpop.f32.mrb[107].mxu1  ;;  %v1866_v52 = vpop.f32.mrb[75].mxu0  ;;  %v2414_v53 = vmul.f32 %v2047_v48, %v2047_v48 }
 0x1e8   :  { %2269 = vst [vmem:[#allocation2 + $0x40] sm:$0xff] %v2039_v61  ;;  %v2339_v6 = vadd.f32 %v2338_v46, %v2039_v61  ;;  %v2412_v42 = vmul.f32 %v2039_v61, %v2039_v61  ;;  %v2474_v63 = vadd.f32 %v2473_v59, %v2411_v29  ;;  %v2042_v28 = vadd.f32 %v2041_v21, %v4136_v34 }
 0x1e9   :  { %2272 = vst [vmem:[#allocation2 + $0x58] sm:$0xff] %v2050_v36  ;;  %v2415_v26 = vmul.f32 %v2050_v36, %v2050_v36 }
 0x1ea   :  { %v2475_v15 = vadd.f32 %v2474_v63, %v2412_v42  ;;  %2270 = vst [vmem:[#allocation2 + $0x48] sm:$0xff] %v2042_v28  ;;  %v2340_v24 = vadd.f32 %v2339_v6, %v2042_v28  ;;  %v2413_v20 = vmul.f32 %v2042_v28, %v2042_v28 }
 0x1ec   :  { %v2341_v8 = vadd.f32 %v2340_v24, %v2047_v48  ;;  %v2476_v54 = vadd.f32 %v2475_v15, %v2413_v20  ;;  %v1869_v60 = vpop.f32.mrb[76].mxu0  ;;  %v2868_v1 = vpop.f32.mrb[108].mxu1 }
 0x1ed   :  { %v4274_v50 = vadd.f32 %v1869_v60, %v4102_v5  ;;  %v2063_v55 = vadd.f32 %v2868_v1, %v4157_v11  ;;  %v1871_v44 = vpop.f32.mrb[77].mxu0  ;;  %v2054_v51 = vpop.f32.mrb[109].mxu1 }
 0x1ee   :  { %v2477_v4 = vadd.f32 %v2476_v54, %v2414_v53  ;;  %v2055_v34 = vadd.f32 %v2054_v51, %v4149_v58  ;;  %v2342_v29 = vadd.f32 %v2341_v8, %v2050_v36  ;;  %v1872_v59 = vpop.f32.mrb[78].mxu0  ;;  %v2869_v61 = vpop.f32.mrb[110].mxu1 }
 0x1ef   :  { %2275 = vst [vmem:[#allocation2 + $0x70] sm:$0xff] %v2063_v55  ;;  %v4279_v48 = vadd.f32 %v1872_v59, %v4112_v12  ;;  %v2066_v46 = vadd.f32 %v2869_v61, %v4161_v18  ;;  %v2057_v9 = vpop.f32.mrb[111].mxu1  ;;  %v1874_v5 = vpop.f32.mrb[79].mxu0  ;;  %v2418_v42 = vmul.f32 %v2063_v55, %v2063_v55 }
 0x1f0   :  { %2273 = vst [vmem:[#allocation2 + $0x60] sm:$0xff] %v2055_v34  ;;  %v2343_v37 = vadd.f32 %v2342_v29, %v2055_v34  ;;  %v2416_v11 = vmul.f32 %v2055_v34, %v2055_v34  ;;  %v2478_v21 = vadd.f32 %v2477_v4, %v2415_v26  ;;  %v2058_v52 = vadd.f32 %v2057_v9, %v4153_v3 }
 0x1f1   :  { %2276 = vst [vmem:[#allocation2 + $0x78] sm:$0xff] %v2066_v46  ;;  %v2419_v8 = vmul.f32 %v2066_v46, %v2066_v46 }
 0x1f2   :  { %v2479_v6 = vadd.f32 %v2478_v21, %v2416_v11  ;;  %2274 = vst [vmem:[#allocation2 + $0x68] sm:$0xff] %v2058_v52  ;;  %v2344_v58 = vadd.f32 %v2343_v37, %v2058_v52  ;;  %v2417_v36 = vmul.f32 %v2058_v52, %v2058_v52 }
 0x1f4   :  { %v2345_v63 = vadd.f32 %v2344_v58, %v2063_v55  ;;  %v2480_v28 = vadd.f32 %v2479_v6, %v2417_v36  ;;  %v1877_v12 = vpop.f32.mrb[80].mxu0  ;;  %v2872_v15 = vpop.f32.mrb[112].mxu1 }
 0x1f5   :  { %v4284_v18 = vadd.f32 %v1877_v12, %v4124_v22  ;;  %v2079_v24 = vadd.f32 %v2872_v15, %v4176_v14  ;;  %v1879_v20 = vpop.f32.mrb[81].mxu0  ;;  %v2070_v53 = vpop.f32.mrb[113].mxu1 }
 0x1f6   :  { %v2481_v54 = vadd.f32 %v2480_v28, %v2418_v42  ;;  %v2071_v3 = vadd.f32 %v2070_v53, %v4166_v38  ;;  %v2346_v60 = vadd.f32 %v2345_v63, %v2066_v46  ;;  %v1880_v1 = vpop.f32.mrb[82].mxu0  ;;  %v2873_v44 = vpop.f32.mrb[114].mxu1 }
 0x1f7   :  { %2279 = vst [vmem:[#allocation2 + $0x90] sm:$0xff] %v2079_v24  ;;  %v4289_v55 = vadd.f32 %v1880_v1, %v4134_v33  ;;  %v2082_v51 = vadd.f32 %v2873_v44, %v4181_v32  ;;  %v2073_v26 = vpop.f32.mrb[115].mxu1  ;;  %v1882_v22 = vpop.f32.mrb[83].mxu0  ;;  %v2422_v46 = vmul.f32 %v2079_v24, %v2079_v24 }
 0x1f8   :  { %2277 = vst [vmem:[#allocation2 + $0x80] sm:$0xff] %v2071_v3  ;;  %v2347_v4 = vadd.f32 %v2346_v60, %v2071_v3  ;;  %v2420_v14 = vmul.f32 %v2071_v3, %v2071_v3  ;;  %v2482_v34 = vadd.f32 %v2481_v54, %v2419_v8  ;;  %v2074_v29 = vadd.f32 %v2073_v26, %v4171_v56 }
 0x1f9   :  { %2280 = vst [vmem:[#allocation2 + $0x98] sm:$0xff] %v2082_v51  ;;  %v2423_v6 = vmul.f32 %v2082_v51, %v2082_v51 }
 0x1fa   :  { %v2483_v59 = vadd.f32 %v2482_v34, %v2420_v14  ;;  %2278 = vst [vmem:[#allocation2 + $0x88] sm:$0xff] %v2074_v29  ;;  %v2348_v38 = vadd.f32 %v2347_v4, %v2074_v29  ;;  %v2421_v61 = vmul.f32 %v2074_v29, %v2074_v29 }
 0x1fc   :  { %v2349_v9 = vadd.f32 %v2348_v38, %v2079_v24  ;;  %v2484_v5 = vadd.f32 %v2483_v59, %v2421_v61  ;;  %v1885_v33 = vpop.f32.mrb[84].mxu0  ;;  %v2876_v37 = vpop.f32.mrb[116].mxu1 }
 0x1fd   :  { %v4294_v32 = vadd.f32 %v1885_v33, %v4139_v41  ;;  %v2095_v11 = vadd.f32 %v2876_v37, %v4196_v40  ;;  %v1887_v21 = vpop.f32.mrb[85].mxu0  ;;  %v2086_v52 = vpop.f32.mrb[117].mxu1 }
 0x1fe   :  { %v2485_v58 = vadd.f32 %v2484_v5, %v2422_v46  ;;  %v2087_v56 = vadd.f32 %v2086_v52, %v4186_v62  ;;  %v2350_v36 = vadd.f32 %v2349_v9, %v2082_v51  ;;  %v1888_v42 = vpop.f32.mrb[86].mxu0  ;;  %v2877_v63 = vpop.f32.mrb[118].mxu1 }
 0x1ff   :  { %2283 = vst [vmem:[#allocation2 + $0xb0] sm:$0xff] %v2095_v11  ;;  %v4299_v28 = vadd.f32 %v1888_v42, %v4143_v49  ;;  %v2098_v12 = vadd.f32 %v2877_v63, %v4201_v7  ;;  %v2089_v15 = vpop.f32.mrb[119].mxu1  ;;  %v1890_v41 = vpop.f32.mrb[87].mxu0  ;;  %v2426_v3 = vmul.f32 %v2095_v11, %v2095_v11 }
 0x200   :  { %2281 = vst [vmem:[#allocation2 + $0xa0] sm:$0xff] %v2087_v56  ;;  %v2351_v24 = vadd.f32 %v2350_v36, %v2087_v56  ;;  %v2424_v40 = vmul.f32 %v2087_v56, %v2087_v56  ;;  %v2486_v20 = vadd.f32 %v2485_v58, %v2423_v6  ;;  %v2090_v53 = vadd.f32 %v2089_v15, %v4191_v16 }
 0x201   :  { %2284 = vst [vmem:[#allocation2 + $0xb8] sm:$0xff] %v2098_v12  ;;  %v2427_v4 = vmul.f32 %v2098_v12, %v2098_v12 }
 0x202   :  { %v2487_v8 = vadd.f32 %v2486_v20, %v2424_v40  ;;  %2282 = vst [vmem:[#allocation2 + $0xa8] sm:$0xff] %v2090_v53  ;;  %v2352_v62 = vadd.f32 %v2351_v24, %v2090_v53  ;;  %v2425_v54 = vmul.f32 %v2090_v53, %v2090_v53 }
 0x204   :  { %v2353_v60 = vadd.f32 %v2352_v62, %v2095_v11  ;;  %v2488_v1 = vadd.f32 %v2487_v8, %v2425_v54  ;;  %v1893_v49 = vpop.f32.mrb[88].mxu0  ;;  %v2880_v44 = vpop.f32.mrb[120].mxu1 }
 0x205   :  { %v4304_v7 = vadd.f32 %v1893_v49, %v4147_v57  ;;  %v2111_v51 = vadd.f32 %v2880_v44, %v4216_v27  ;;  %v1895_v26 = vpop.f32.mrb[89].mxu0  ;;  %v2102_v22 = vpop.f32.mrb[121].mxu1 }
 0x206   :  { %v2489_v14 = vadd.f32 %v2488_v1, %v2426_v3  ;;  %v2103_v16 = vadd.f32 %v2102_v22, %v4206_v19  ;;  %v2354_v34 = vadd.f32 %v2353_v60, %v2098_v12  ;;  %v1896_v29 = vpop.f32.mrb[90].mxu0  ;;  %v2881_v59 = vpop.f32.mrb[122].mxu1 }
 0x207   :  { %2287 = vst [vmem:[#allocation2 + $0xd0] sm:$0xff] %v2111_v51  ;;  %v4309_v38 = vadd.f32 %v1896_v29, %v4151_v2  ;;  %v2114_v61 = vadd.f32 %v2881_v59, %v4221_v31  ;;  %v2105_v46 = vpop.f32.mrb[123].mxu1  ;;  %v1898_v57 = vpop.f32.mrb[91].mxu0  ;;  %v2430_v21 = vmul.f32 %v2111_v51, %v2111_v51 }
 0x208   :  { %2285 = vst [vmem:[#allocation2 + $0xc0] sm:$0xff] %v2103_v16  ;;  %v2355_v9 = vadd.f32 %v2354_v34, %v2103_v16  ;;  %v2428_v27 = vmul.f32 %v2103_v16, %v2103_v16  ;;  %v2490_v5 = vadd.f32 %v2489_v14, %v2427_v4  ;;  %v2106_v33 = vadd.f32 %v2105_v46, %v4211_v23  ;;  %v4446_v46 = vld [vmem:[#allocation9_spill] sm:$0xff] }
 0x209   :  { %2288 = vst [vmem:[#allocation2 + $0xd8] sm:$0xff] %v2114_v61  ;;  %v2431_v63 = vmul.f32 %v2114_v61, %v2114_v61 }
 0x20a   :  { %v2491_v37 = vadd.f32 %v2490_v5, %v2428_v27  ;;  %2286 = vst [vmem:[#allocation2 + $0xc8] sm:$0xff] %v2106_v33  ;;  %v2356_v19 = vadd.f32 %v2355_v9, %v2106_v33  ;;  %v2429_v11 = vmul.f32 %v2106_v33, %v2106_v33 }
 0x20c   :  { %v2357_v52 = vadd.f32 %v2356_v19, %v2111_v51  ;;  %v2492_v6 = vadd.f32 %v2491_v37, %v2429_v11  ;;  %v1901_v2 = vpop.f32.mrb[92].mxu0  ;;  %v2884_v58 = vpop.f32.mrb[124].mxu1  ;;  %v4447_v37 = vld [vmem:[#allocation25_spill] sm:$0xff] }
 0x20d   :  { %v4314_v31 = vadd.f32 %v1901_v2, %v4155_v10  ;;  %v2127_v56 = vadd.f32 %v2884_v58, %v4236_v43  ;;  %v1903_v36 = vpop.f32.mrb[93].mxu0  ;;  %v2118_v42 = vpop.f32.mrb[125].mxu1 }
 0x20e   :  { %v2493_v12 = vadd.f32 %v2492_v6, %v2430_v21  ;;  %v2119_v23 = vadd.f32 %v2118_v42, %v4226_v35  ;;  %v2358_v15 = vadd.f32 %v2357_v52, %v2114_v61  ;;  %v1904_v41 = vpop.f32.mrb[94].mxu0  ;;  %v2885_v24 = vpop.f32.mrb[126].mxu1  ;;  %v4448_v42 = vld [vmem:[#allocation10_spill] sm:$0xff] }
 0x20f   :  { %2291 = vst [vmem:[#allocation2 + $0xf0] sm:$0xff] %v2127_v56  ;;  %v4319_v40 = vadd.f32 %v1904_v41, %v4159_v17  ;;  %v2130_v20 = vadd.f32 %v2885_v24, %v4241_v47  ;;  %v2121_v53 = vpop.f32.mrb[127].mxu1  ;;  %v1906_v10 = vpop.f32.mrb[95].mxu0  ;;  %v2434_v1 = vmul.f32 %v2127_v56, %v2127_v56 }
 0x210   :  { %2289 = vst [vmem:[#allocation2 + $0xe0] sm:$0xff] %v2119_v23  ;;  %v2359_v8 = vadd.f32 %v2358_v15, %v2119_v23  ;;  %v2432_v43 = vmul.f32 %v2119_v23, %v2119_v23  ;;  %v2494_v62 = vadd.f32 %v2493_v12, %v2431_v63  ;;  %v2122_v54 = vadd.f32 %v2121_v53, %v4231_v39  ;;  %v4445_v39 = vld [vmem:[#allocation24_spill] sm:$0xff] }
 0x211   :  { %2292 = vst [vmem:[#allocation2 + $0xf8] sm:$0xff] %v2130_v20  ;;  %v2435_v14 = vmul.f32 %v2130_v20, %v2130_v20 }
 0x212   :  { %v2495_v3 = vadd.f32 %v2494_v62, %v2432_v43  ;;  %2290 = vst [vmem:[#allocation2 + $0xe8] sm:$0xff] %v2122_v54  ;;  %v2360_v35 = vadd.f32 %v2359_v8, %v2122_v54  ;;  %v2433_v60 = vmul.f32 %v2122_v54, %v2122_v54  ;;  %v4449_v8 = vld [vmem:[#allocation11_spill] sm:$0xff] }
 0x214   :  { %v2361_v49 = vadd.f32 %v2360_v35, %v2127_v56  ;;  %v2496_v44 = vadd.f32 %v2495_v3, %v2433_v60  ;;  %v1909_v17 = vpop.f32.mrb[96].mxu0  ;;  %v2888_v51 = vpop.f32.mrb[128].mxu1 }
 0x215   :  { %v4324_v47 = vadd.f32 %v1909_v17, %v4163_v30  ;;  %v2143_v26 = vadd.f32 %v2888_v51, %v4254_v45  ;;  %v1911_v22 = vpop.f32.mrb[97].mxu0  ;;  %v2134_v4 = vpop.f32.mrb[129].mxu1 }
 0x216   :  { %v2497_v16 = vadd.f32 %v2496_v44, %v2434_v1  ;;  %v2135_v34 = vadd.f32 %v2134_v4, %v4445_v39  ;;  %v2362_v29 = vadd.f32 %v2361_v49, %v2130_v20  ;;  %v1912_v59 = vpop.f32.mrb[98].mxu0  ;;  %v2889_v61 = vpop.f32.mrb[130].mxu1 }
 0x217   :  { %2295 = vst [vmem:[#allocation2 + $0x110] sm:$0xff] %v2143_v26  ;;  %v4329_v57 = vadd.f32 %v1912_v59, %v4446_v46  ;;  %v2146_v9 = vadd.f32 %v2889_v61, %v4259_v0  ;;  %v2137_v27 = vpop.f32.mrb[131].mxu1  ;;  %v1914_v30 = vpop.f32.mrb[99].mxu0  ;;  %v2438_v6 = vmul.f32 %v2143_v26, %v2143_v26 }
 0x218   :  { %2293 = vst [vmem:[#allocation2 + $0x100] sm:$0xff] %v2135_v34  ;;  %v2363_v5 = vadd.f32 %v2362_v29, %v2135_v34  ;;  %v2436_v45 = vmul.f32 %v2135_v34, %v2135_v34  ;;  %v2498_v33 = vadd.f32 %v2497_v16, %v2435_v14  ;;  %v2138_v19 = vadd.f32 %v2137_v27, %v4447_v37  ;;  %v4450_v14 = vld [vmem:[#allocation12_spill] sm:$0xff]  ;;  %v4451_v27 = vld [vmem:[#allocation13_spill] sm:$0xff] }
 0x219   :  { %2296 = vst [vmem:[#allocation2 + $0x118] sm:$0xff] %v2146_v9  ;;  %v2439_v15 = vmul.f32 %v2146_v9, %v2146_v9 }
 0x21a   :  { %v2499_v11 = vadd.f32 %v2498_v33, %v2436_v45  ;;  %2294 = vst [vmem:[#allocation2 + $0x108] sm:$0xff] %v2138_v19  ;;  %v2364_v21 = vadd.f32 %v2363_v5, %v2138_v19  ;;  %v2437_v52 = vmul.f32 %v2138_v19, %v2138_v19 }
 0x21c   :  { %v2365_v2 = vadd.f32 %v2364_v21, %v2143_v26  ;;  %v2500_v58 = vadd.f32 %v2499_v11, %v2437_v52  ;;  %v1917_v56 = vpop.f32.mrb[100].mxu0  ;;  %v2892_v36 = vpop.f32.mrb[132].mxu1 }
 0x21d   :  { %v4334_v0 = vadd.f32 %v1917_v56, %v4448_v42  ;;  %v2159_v63 = vadd.f32 %v2892_v36, %v4274_v50  ;;  %v1919_v12 = vpop.f32.mrb[101].mxu0  ;;  %v2150_v23 = vpop.f32.mrb[133].mxu1  ;;  %v4452_v42 = vld [vmem:[#allocation14_spill] sm:$0xff] }
 0x21e   :  { %v2501_v41 = vadd.f32 %v2500_v58, %v2438_v6  ;;  %v2151_v24 = vadd.f32 %v2150_v23, %v4264_v13  ;;  %v2366_v20 = vadd.f32 %v2365_v2, %v2146_v9  ;;  %v1920_v53 = vpop.f32.mrb[102].mxu0  ;;  %v2893_v10 = vpop.f32.mrb[134].mxu1 }
 0x21f   :  { %2299 = vst [vmem:[#allocation2 + $0x130] sm:$0xff] %v2159_v63  ;;  %v4339_v43 = vadd.f32 %v1920_v53, %v4449_v8  ;;  %v2162_v62 = vadd.f32 %v2893_v10, %v4279_v48  ;;  %v2153_v54 = vpop.f32.mrb[135].mxu1  ;;  %v1922_v3 = vpop.f32.mrb[103].mxu0  ;;  %v2442_v17 = vmul.f32 %v2159_v63, %v2159_v63  ;;  %v4453_v10 = vld [vmem:[#allocation15_spill] sm:$0xff] }
 0x220   :  { %2297 = vst [vmem:[#allocation2 + $0x120] sm:$0xff] %v2151_v24  ;;  %v2367_v35 = vadd.f32 %v2366_v20, %v2151_v24  ;;  %v2440_v50 = vmul.f32 %v2151_v24, %v2151_v24  ;;  %v2502_v60 = vadd.f32 %v2501_v41, %v2439_v15  ;;  %v2154_v1 = vadd.f32 %v2153_v54, %v4269_v25 }
 0x221   :  { %2300 = vst [vmem:[#allocation2 + $0x138] sm:$0xff] %v2162_v62  ;;  %v2443_v29 = vmul.f32 %v2162_v62, %v2162_v62 }
 0x222   :  { %v2503_v49 = vadd.f32 %v2502_v60, %v2440_v50  ;;  %2298 = vst [vmem:[#allocation2 + $0x128] sm:$0xff] %v2154_v1  ;;  %v2368_v13 = vadd.f32 %v2367_v35, %v2154_v1  ;;  %v2441_v44 = vmul.f32 %v2154_v1, %v2154_v1 }
 0x224   :  { %v2369_v51 = vadd.f32 %v2368_v13, %v2159_v63  ;;  %v2504_v26 = vadd.f32 %v2503_v49, %v2441_v44  ;;  %v1925_v22 = vpop.f32.mrb[104].mxu0  ;;  %v2896_v4 = vpop.f32.mrb[136].mxu1 }
 0x225   :  { %v4344_v48 = vadd.f32 %v1925_v22, %v4450_v14  ;;  %v2175_v16 = vadd.f32 %v2896_v4, %v4294_v32  ;;  %v1927_v39 = vpop.f32.mrb[105].mxu0  ;;  %v2166_v34 = vpop.f32.mrb[137].mxu1  ;;  %v4454_v22 = vld [vmem:[#allocation16_spill] sm:$0xff] }
 0x226   :  { %v2505_v59 = vadd.f32 %v2504_v26, %v2442_v17  ;;  %v2167_v25 = vadd.f32 %v2166_v34, %v4284_v18  ;;  %v2370_v61 = vadd.f32 %v2369_v51, %v2162_v62  ;;  %v1928_v46 = vpop.f32.mrb[106].mxu0  ;;  %v2897_v9 = vpop.f32.mrb[138].mxu1 }
 0x227   :  { %2303 = vst [vmem:[#allocation2 + $0x150] sm:$0xff] %v2175_v16  ;;  %v4349_v30 = vadd.f32 %v1928_v46, %v4451_v27  ;;  %v2178_v5 = vadd.f32 %v2897_v9, %v4299_v28  ;;  %v2169_v45 = vpop.f32.mrb[139].mxu1  ;;  %v1930_v33 = vpop.f32.mrb[107].mxu0  ;;  %v2446_v6 = vmul.f32 %v2175_v16, %v2175_v16 }
 0x228   :  { %2301 = vst [vmem:[#allocation2 + $0x140] sm:$0xff] %v2167_v25  ;;  %v2371_v37 = vadd.f32 %v2370_v61, %v2167_v25  ;;  %v2444_v32 = vmul.f32 %v2167_v25, %v2167_v25  ;;  %v2506_v19 = vadd.f32 %v2505_v59, %v2443_v29  ;;  %v2170_v11 = vadd.f32 %v2169_v45, %v4289_v55  ;;  %v4455_v61 = vld [vmem:[#allocation17_spill] sm:$0xff] }
 0x229   :  { %2304 = vst [vmem:[#allocation2 + $0x158] sm:$0xff] %v2178_v5  ;;  %v2447_v15 = vmul.f32 %v2178_v5, %v2178_v5 }
 0x22a   :  { %v2507_v21 = vadd.f32 %v2506_v19, %v2444_v32  ;;  %2302 = vst [vmem:[#allocation2 + $0x148] sm:$0xff] %v2170_v11  ;;  %v2372_v18 = vadd.f32 %v2371_v37, %v2170_v11  ;;  %v2445_v52 = vmul.f32 %v2170_v11, %v2170_v11 }
 0x22c   :  { %v2373_v2 = vadd.f32 %v2372_v18, %v2175_v16  ;;  %v2508_v58 = vadd.f32 %v2507_v21, %v2445_v52  ;;  %v1933_v56 = vpop.f32.mrb[108].mxu0  ;;  %v2900_v36 = vpop.f32.mrb[140].mxu1 }
 0x22d   :  { %v1934_v28 = vadd.f32 %v1933_v56, %v4452_v42  ;;  %v2191_v63 = vadd.f32 %v2900_v36, %v4314_v31  ;;  %v1935_v12 = vpop.f32.mrb[109].mxu0  ;;  %v2182_v23 = vpop.f32.mrb[141].mxu1 }
 0x22e   :  { %v2509_v41 = vadd.f32 %v2508_v58, %v2446_v6  ;;  %v2183_v55 = vadd.f32 %v2182_v23, %v4304_v7  ;;  %v2374_v24 = vadd.f32 %v2373_v2, %v2178_v5  ;;  %v1936_v20 = vpop.f32.mrb[110].mxu0  ;;  %v2901_v53 = vpop.f32.mrb[142].mxu1  ;;  %v4456_v2 = vld [vmem:[#allocation18_spill] sm:$0xff] }
 0x22f   :  { %2307 = vst [vmem:[#allocation2 + $0x170] sm:$0xff] %v2191_v63  ;;  %v1937_v8 = vadd.f32 %v1936_v20, %v4453_v10  ;;  %v2194_v62 = vadd.f32 %v2901_v53, %v4319_v40  ;;  %v2185_v54 = vpop.f32.mrb[143].mxu1  ;;  %v1938_v3 = vpop.f32.mrb[111].mxu0  ;;  %v2450_v13 = vmul.f32 %v2191_v63, %v2191_v63 }
 0x230   :  { %2305 = vst [vmem:[#allocation2 + $0x160] sm:$0xff] %v2183_v55  ;;  %v2375_v35 = vadd.f32 %v2374_v24, %v2183_v55  ;;  %v2448_v50 = vmul.f32 %v2183_v55, %v2183_v55  ;;  %v2510_v31 = vadd.f32 %v2509_v41, %v2447_v15  ;;  %v2186_v60 = vadd.f32 %v2185_v54, %v4309_v38  ;;  %v4457_v41 = vld [vmem:[#allocation19_spill] sm:$0xff] }
 0x231   :  { %2308 = vst [vmem:[#allocation2 + $0x178] sm:$0xff] %v2194_v62  ;;  %v2451_v39 = vmul.f32 %v2194_v62, %v2194_v62 }
 0x232   :  { %v2511_v1 = vadd.f32 %v2510_v31, %v2448_v50  ;;  %2306 = vst [vmem:[#allocation2 + $0x168] sm:$0xff] %v2186_v60  ;;  %v2376_v7 = vadd.f32 %v2375_v35, %v2186_v60  ;;  %v2449_v49 = vmul.f32 %v2186_v60, %v2186_v60 }
 0x234   :  { %v2377_v44 = vadd.f32 %v2376_v7, %v2191_v63  ;;  %v2512_v17 = vadd.f32 %v2511_v1, %v2449_v49  ;;  %v1941_v51 = vpop.f32.mrb[112].mxu0  ;;  %v2904_v26 = vpop.f32.mrb[144].mxu1  ;;  %v4458_v49 = vld [vmem:[#allocation20_spill] sm:$0xff] }
 0x235   :  { %v4360_v40 = vadd.f32 %v1941_v51, %v4454_v22  ;;  %v2207_v4 = vadd.f32 %v2904_v26, %v4334_v0  ;;  %v1943_v14 = vpop.f32.mrb[113].mxu0  ;;  %v2198_v16 = vpop.f32.mrb[145].mxu1 }
 0x236   :  { %v2513_v34 = vadd.f32 %v2512_v17, %v2450_v13  ;;  %v2199_v38 = vadd.f32 %v2198_v16, %v4324_v47  ;;  %v2378_v29 = vadd.f32 %v2377_v44, %v2194_v62  ;;  %v1944_v59 = vpop.f32.mrb[114].mxu0  ;;  %v2905_v25 = vpop.f32.mrb[146].mxu1  ;;  %v4459_v16 = vld [vmem:[#allocation21_spill] sm:$0xff] }
 0x237   :  { %2311 = vst [vmem:[#allocation2 + $0x190] sm:$0xff] %v2207_v4  ;;  %v4365_v46 = vadd.f32 %v1944_v59, %v4455_v61  ;;  %v2210_v9 = vadd.f32 %v2905_v25, %v4339_v43  ;;  %v2201_v27 = vpop.f32.mrb[147].mxu1  ;;  %v1946_v5 = vpop.f32.mrb[115].mxu0  ;;  %v2454_v11 = vmul.f32 %v2207_v4, %v2207_v4 }
 0x238   :  { %2309 = vst [vmem:[#allocation2 + $0x180] sm:$0xff] %v2199_v38  ;;  %v2379_v45 = vadd.f32 %v2378_v29, %v2199_v38  ;;  %v2452_v0 = vmul.f32 %v2199_v38, %v2199_v38  ;;  %v2514_v33 = vadd.f32 %v2513_v34, %v2451_v39  ;;  %v2202_v37 = vadd.f32 %v2201_v27, %v4329_v57 }
 0x239   :  { %2312 = vst [vmem:[#allocation2 + $0x198] sm:$0xff] %v2210_v9  ;;  %v2455_v42 = vmul.f32 %v2210_v9, %v2210_v9 }
 0x23a   :  { %v2515_v32 = vadd.f32 %v2514_v33, %v2452_v0  ;;  %2310 = vst [vmem:[#allocation2 + $0x188] sm:$0xff] %v2202_v37  ;;  %v2380_v47 = vadd.f32 %v2379_v45, %v2202_v37  ;;  %v2453_v19 = vmul.f32 %v2202_v37, %v2202_v37 }
 0x23c   :  { %v2381_v21 = vadd.f32 %v2380_v47, %v2207_v4  ;;  %v2516_v18 = vadd.f32 %v2515_v32, %v2453_v19  ;;  %v1949_v52 = vpop.f32.mrb[116].mxu0  ;;  %v2908_v6 = vpop.f32.mrb[148].mxu1  ;;  %v4460_v47 = vld [vmem:[#allocation22_spill] sm:$0xff] }
 0x23d   :  { %v1950_v43 = vadd.f32 %v1949_v52, %v4456_v2  ;;  %v2223_v58 = vadd.f32 %v2908_v6, %v1934_v28  ;;  %v1951_v56 = vpop.f32.mrb[117].mxu0  ;;  %v2214_v36 = vpop.f32.mrb[149].mxu1 }
 0x23e   :  { %v2517_v63 = vadd.f32 %v2516_v18, %v2454_v11  ;;  %v2215_v12 = vadd.f32 %v2214_v36, %v4344_v48  ;;  %v2382_v57 = vadd.f32 %v2381_v21, %v2210_v9  ;;  %v1952_v23 = vpop.f32.mrb[118].mxu0  ;;  %v2909_v15 = vpop.f32.mrb[150].mxu1  ;;  %v4461_v56 = vld [vmem:[#allocation23_spill] sm:$0xff] }
 0x23f   :  { %2315 = vst [vmem:[#allocation2 + $0x1b0] sm:$0xff] %v2223_v58  ;;  %v1953_v55 = vadd.f32 %v1952_v23, %v4457_v41  ;;  %v2226_v24 = vadd.f32 %v2909_v15, %v1937_v8  ;;  %v2217_v20 = vpop.f32.mrb[151].mxu1  ;;  %v1954_v53 = vpop.f32.mrb[119].mxu0  ;;  %v2458_v50 = vmul.f32 %v2223_v58, %v2223_v58 }
 0x240   :  { %2313 = vst [vmem:[#allocation2 + $0x1a0] sm:$0xff] %v2215_v12  ;;  %v2383_v10 = vadd.f32 %v2382_v57, %v2215_v12  ;;  %v2456_v62 = vmul.f32 %v2215_v12, %v2215_v12  ;;  %v2518_v54 = vadd.f32 %v2517_v63, %v2455_v42  ;;  %v2218_v28 = vadd.f32 %v2217_v20, %v4349_v30 }
 0x241   :  { %2316 = vst [vmem:[#allocation2 + $0x1b8] sm:$0xff] %v2226_v24  ;;  %v2459_v51 = vmul.f32 %v2226_v24, %v2226_v24 }
 0x242   :  { %v2519_v3 = vadd.f32 %v2518_v54, %v2456_v62  ;;  %2314 = vst [vmem:[#allocation2 + $0x1a8] sm:$0xff] %v2218_v28  ;;  %v2384_v35 = vadd.f32 %v2383_v10, %v2218_v28  ;;  %v2457_v48 = vmul.f32 %v2218_v28, %v2218_v28 }
 0x244   :  { %v2385_v31 = vadd.f32 %v2384_v35, %v2223_v58  ;;  %v2520_v60 = vadd.f32 %v2519_v3, %v2457_v48  ;;  %v1957_v1 = vpop.f32.mrb[120].mxu0  ;;  %v2912_v7 = vpop.f32.mrb[152].mxu1 }
 0x245   :  { %v1958_v8 = vadd.f32 %v1957_v1, %v4458_v49  ;;  %v2239_v13 = vadd.f32 %v2912_v7, %v1950_v43  ;;  %v1959_v44 = vpop.f32.mrb[121].mxu0  ;;  %v2230_v17 = vpop.f32.mrb[153].mxu1 }
 0x246   :  { %v2521_v26 = vadd.f32 %v2520_v60, %v2458_v50  ;;  %v2231_v22 = vadd.f32 %v2230_v17, %v4360_v40  ;;  %v2386_v30 = vadd.f32 %v2385_v31, %v2226_v24  ;;  %v1960_v4 = vpop.f32.mrb[122].mxu0  ;;  %v2913_v14 = vpop.f32.mrb[154].mxu1 }
 0x247   :  { %2319 = vst [vmem:[#allocation2 + $0x1d0] sm:$0xff] %v2239_v13  ;;  %v1961_v39 = vadd.f32 %v1960_v4, %v4459_v16  ;;  %v2242_v34 = vadd.f32 %v2913_v14, %v1953_v55  ;;  %v2233_v38 = vpop.f32.mrb[155].mxu1  ;;  %v1962_v29 = vpop.f32.mrb[123].mxu0  ;;  %v2462_v45 = vmul.f32 %v2239_v13, %v2239_v13 }
 0x248   :  { %2317 = vst [vmem:[#allocation2 + $0x1c0] sm:$0xff] %v2231_v22  ;;  %v2387_v59 = vadd.f32 %v2386_v30, %v2231_v22  ;;  %v2460_v25 = vmul.f32 %v2231_v22, %v2231_v22  ;;  %v2522_v61 = vadd.f32 %v2521_v26, %v2459_v51  ;;  %v2234_v9 = vadd.f32 %v2233_v38, %v4365_v46 }
 0x249   :  { %2320 = vst [vmem:[#allocation2 + $0x1d8] sm:$0xff] %v2242_v34  ;;  %v2463_v18 = vmul.f32 %v2242_v34, %v2242_v34 }
 0x24a   :  { %v2523_v27 = vadd.f32 %v2522_v61, %v2460_v25  ;;  %2318 = vst [vmem:[#allocation2 + $0x1c8] sm:$0xff] %v2234_v9  ;;  %v2388_v5 = vadd.f32 %v2387_v59, %v2234_v9  ;;  %v2461_v40 = vmul.f32 %v2234_v9, %v2234_v9 }
 0x24c   :  { %v2389_v0 = vadd.f32 %v2388_v5, %v2239_v13  ;;  %v2524_v33 = vadd.f32 %v2523_v27, %v2461_v40  ;;  %v1965_v37 = vpop.f32.mrb[124].mxu0  ;;  %v2916_v32 = vpop.f32.mrb[156].mxu1 }
 0x24d   :  { %v1966_v19 = vadd.f32 %v1965_v37, %v4460_v47  ;;  %v1967_v11 = vpop.f32.mrb[125].mxu0  ;;  %v2246_v21 = vpop.f32.mrb[157].mxu1 }
 0x24e   :  { %v2525_v52 = vadd.f32 %v2524_v33, %v2462_v45  ;;  %v2247_v6 = vadd.f32 %v2246_v21, %v1958_v8  ;;  %v2390_v46 = vadd.f32 %v2389_v0, %v2242_v34  ;;  %v1968_v2 = vpop.f32.mrb[126].mxu0  ;;  %v2917_v43 = vpop.f32.mrb[158].mxu1 }
 0x24f   :  { %v2255_v58 = vadd.f32 %v2916_v32, %v1966_v19  ;;  %v1969_v36 = vadd.f32 %v1968_v2, %v4461_v56  ;;  %v2249_v42 = vpop.f32.mrb[159].mxu1  ;;  %v1970_v63 = vpop.f32.mrb[127].mxu0 }
 0x250   :  { %2321 = vst [vmem:[#allocation2 + $0x1e0] sm:$0xff] %v2247_v6  ;;  %v2391_v12 = vadd.f32 %v2390_v46, %v2247_v6  ;;  %v2464_v57 = vmul.f32 %v2247_v6, %v2247_v6  ;;  %v2526_v23 = vadd.f32 %v2525_v52, %v2463_v18  ;;  %v2250_v15 = vadd.f32 %v2249_v42, %v1961_v39 }
 0x251   :  { %2323 = vst [vmem:[#allocation2 + $0x1f0] sm:$0xff] %v2255_v58  ;;  %v2258_v41 = vadd.f32 %v2917_v43, %v1969_v36  ;;  %v2466_v53 = vmul.f32 %v2255_v58, %v2255_v58 }
 0x252   :  { %v2527_v55 = vadd.f32 %v2526_v23, %v2464_v57  ;;  %2322 = vst [vmem:[#allocation2 + $0x1e8] sm:$0xff] %v2250_v15  ;;  %v2392_v24 = vadd.f32 %v2391_v12, %v2250_v15  ;;  %v2465_v20 = vmul.f32 %v2250_v15, %v2250_v15 }
 0x253   :  { %2324 = vst [vmem:[#allocation2 + $0x1f8] sm:$0xff] %v2258_v41 }
 0x254   :  { %v2393_v10 = vadd.f32 %v2392_v24, %v2255_v58  ;;  %v2528_v62 = vadd.f32 %v2527_v55, %v2465_v20 }
 0x255   :  { %3308 = shalt.err (!%p3305_p4)
}
 0x256   :  { %s3309_s11 = scalar_lea.hbm %s4425_s2, 8192 }
 0x257   :  { %p3310_p5 = scmp.ne.s32.totalorder %s4425_s2, %s3309_s11  ;;  %p3313_p6 = scmp.lt.u32.totalorder %s3309_s11, %s4425_s2 }
 0x259   :  { %p3315_p7 = pnand %p3313_p6, %p3310_p5 }
 0x25b   :  { %3318 = shalt.err (!%p3315_p7)
}
 0x25c   :  { %s3370_s16 = smov 128   ;;  %s3371_s17 = smov 8   ;;  %v2467_v54 = vmul.f32 %v2258_v41, %v2258_v41  ;;  %v2394_v28 = vadd.f32 %v2393_v10, %v2258_v41  ;;  %v2529_v3 = vadd.f32 %v2528_v62, %v2466_v53  ;;  %v2331_v44 = vld [vmem:[#allocation4] sm:$0x1]  ;;  %v2403_v26 = vld [vmem:[#allocation6] sm:$0x1] }
 0x25d   :  { %2550 = dma.vmem_to_hbm [thread:$0]  %s2545_s7, 8192, %s4425_s2, [#allocation3], %s3370_s16, %s3370_s16, %s3371_s17  }
 0x25e   :  { %v2395_v35 = vrot.slane %v2394_v28, 4  ;;  %v2530_v48 = vadd.f32 %v2529_v3, %v2467_v54  ;;  %s3372_s20 = smov [#allocation4]   ;;  %s3373_s2 = smov [#allocation6]  }
 0x25f   :  { %s2557_s21 = sshll.u32 %s3372_s20, 4  ;;  %s2567_s22 = sshll.u32 %s3373_s2, 4  ;;  %s2558_s21 = int_to_ptr.vmem [resolvable:$true] %s2557_s21  ;;  %s4391_s22 = int_to_ptr.vmem [resolvable:$true] %s2567_s22 }
 0x260   :  { %v2396_v50 = vadd.f32 %v2395_v35, %v2394_v28  ;;  %v2531_v31 = vrot.slane %v2530_v48, 4  ;;  %s3319_s23 = scalar_lea.vmem %s2558_s21, 16  ;;  %s3323_s24 = scalar_lea.vmem %s2558_s21, 32 }
 0x261   :  { %p3320_p8 = scmp.ne.s32.totalorder %s2558_s21, %s3319_s23  ;;  %p3324_p9 = scmp.lt.s32.totalorder %s2558_s21, %s2558_s21 }
 0x262   :  { %v2397_v60 = vrot.slane %v2396_v50, 2  ;;  %v2532_v1 = vadd.f32 %v2531_v31, %v2530_v48  ;;  %p3325_p10 = scmp.lt.s32.totalorder %s3323_s24, %s3319_s23 }
 0x264   :  { %v2398_v7 = vadd.f32 %v2397_v60, %v2396_v50  ;;  %v2533_v49 = vrot.slane %v2532_v1, 2  ;;  %p3326_p11 = por %p3325_p10, %p3324_p9 }
 0x266   :  { %v2399_v8 = vrot.slane %v2398_v7, 1  ;;  %v2534_v13 = vadd.f32 %v2533_v49, %v2532_v1  ;;  %p3327_p12 = pnand %p3326_p11, %p3320_p8 }
 0x268   :  { %v2400_v17 = vadd.f32 %v2399_v8, %v2398_v7  ;;  %v2535_v51 = vrot.slane %v2534_v13, 1 }
 0x26a   :  { %v2401_v22 = vadd.f32 %v2400_v17, %v2331_v44  ;;  %v2536_v30 = vadd.f32 %v2535_v51, %v2534_v13 }
 0x26c   :  { %2402 = vst [vmem:[#allocation4] sm:$0x1] %v2401_v22  ;;  %v2537_v4 = vadd.f32 %v2536_v30, %v2403_v26 }
 0x26d   :  { %3330 = shalt.err (!%p3327_p12)
}
 0x26e   :  { %s3331_s27 = scalar_lea.hbm %s4426_s3, 16 }
 0x26f   :  { %p3332_p13 = scmp.ne.s32.totalorder %s4426_s3, %s3331_s27  ;;  %p3335_p0 = scmp.lt.u32.totalorder %s3331_s27, %s4426_s3 }
 0x271   :  { %p3337_p1 = pnand %p3335_p0, %p3332_p13 }
 0x273   :  { %3340 = shalt.err (!%p3337_p1)
}
 0x274   :  { %2560 = dma.vmem_to_hbm [thread:$0]  %s2558_s21, 16, %s4426_s3, [#allocation5]   ;;  %2538 = vst [vmem:[#allocation6] sm:$0x1] %v2537_v4 }
 0x275   :  { %s3341_s0 = scalar_lea.vmem %s4391_s22, 16  ;;  %s3345_s7 = scalar_lea.vmem %s4391_s22, 32 }
 0x276   :  { %p3342_p2 = scmp.ne.s32.totalorder %s4391_s22, %s3341_s0  ;;  %p3346_p3 = scmp.lt.s32.totalorder %s4391_s22, %s4391_s22 }
 0x277   :  { %p3347_p4 = scmp.lt.s32.totalorder %s3345_s7, %s3341_s0 }
 0x279   :  { %p3348_p5 = por %p3347_p4, %p3346_p3 }
 0x27b   :  { %p3349_p6 = pnand %p3348_p5, %p3342_p2 }
 0x27d   :  { %3352 = shalt.err (!%p3349_p6)
}
 0x27e   :  { %s3353_s10 = scalar_lea.hbm %s4427_s4, 16 }
 0x27f   :  { %p3354_p7 = scmp.ne.s32.totalorder %s4427_s4, %s3353_s10  ;;  %p3357_p8 = scmp.lt.u32.totalorder %s3353_s10, %s4427_s4 }
 0x281   :  { %p3359_p9 = pnand %p3357_p8, %p3354_p7 }
 0x283   :  { %3362 = shalt.err (!%p3359_p9)
}
 0x284   :  { %2570 = dma.vmem_to_hbm [thread:$0]  %s4391_s22, 16, %s4427_s4, [#allocation5]  }
 0x285   :  { %3363 = dma.done.wait [#allocation3], 8192  }
 0x286   :  { %3364 = vsyncadd [#allocation3], 4294959104 }
 0x287   :  { %3365 = dma.done.wait [#allocation5], 32  }
 0x288   :  { %3366 = vsyncadd [#allocation5], 4294967264 }
 0x289   :  { %2580 = vsyncpa [#allocation3], 1 }
 0x28a   :  { %2581 = vsyncpa [#allocation5], 1 }

</bundles_post_ra>
